<compile_context>
chip_gen: v5e
topology: v5e:2x2
jax: 0.10.0
libtpu: 0.0.40
codegen_flags: <defaults>
</compile_context>

<pallas_src>
import functools
import math

import jax
import jax.numpy as jnp
from jax.experimental import pallas as pl
from jax.experimental.pallas import tpu as pltpu


def _round_up(x, m):
    return (x + m - 1) // m * m


# ----------------------------- Pallas kernel ------------------------------- #

def _coconv_tap_kernel(w_ref, sh_ref, xw_ref, o_ref, *, tap_offsets, tile_s):
    # w_ref : (T, OC, Cp) bf16  per-batch folded weight (routing * BN scale), tap-major
    # sh_ref: (OC, 1)     f32   per-batch folded shift  (routing * BN shift)
    # xw_ref: (Cp, Lw)    bf16  halo'd window of the flattened, zero-padded input
    # o_ref : (OC, tS)    f32   lane-dense output tile (flat padded-grid indices)
    window = xw_ref[...]                                   # one aligned VMEM load
    acc = jnp.broadcast_to(sh_ref[...], o_ref.shape)       # init with folded BN shift
    for t, off in enumerate(tap_offsets):                  # k^3 static taps, unrolled
        slab = window[:, off:off + tile_s]                 # static lane-offset slice
        acc = acc + jnp.dot(w_ref[t], slab,
                            preferred_element_type=jnp.float32)
    o_ref[...] = acc


def coconv_pallas(w_taps, shift, xw, *, tap_offsets, tile_s, ns_pad):
    # w_taps: (B, T, OC, Cp) bf16   shift: (B, OC, 1) f32
    # xw    : (B, S_tiles, Cp, Lw) bf16
    B, T, OC, Cp = w_taps.shape
    _, s_tiles, _, Lw = xw.shape
    grid = (B, s_tiles)

    kernel = functools.partial(_coconv_tap_kernel,
                               tap_offsets=tap_offsets, tile_s=tile_s)

    flops = 2 * int(B) * int(OC) * int(Cp) * int(T) * int(ns_pad)
    bytes_accessed = int(xw.size) * 2 + int(w_taps.size) * 2 \
        + int(shift.size) * 4 + int(B) * int(OC) * int(ns_pad) * 4

    return pl.pallas_call(
        kernel,
        out_shape=jax.ShapeDtypeStruct((B, OC, ns_pad), jnp.float32),
        grid_spec=pltpu.PrefetchScalarGridSpec(
            num_scalar_prefetch=0,
            grid=grid,
            in_specs=[
                # weight & shift: index map ignores s -> DMA'd once per batch
                pl.BlockSpec((None, T, OC, Cp), lambda b, s: (b, 0, 0, 0)),
                pl.BlockSpec((None, OC, 1), lambda b, s: (b, 0, 0)),
                # halo'd input window for this (b, s) tile
                pl.BlockSpec((None, None, Cp, Lw), lambda b, s: (b, s, 0, 0)),
            ],
            out_specs=pl.BlockSpec((None, OC, tile_s), lambda b, s: (b, 0, s)),
        ),
        compiler_params=pltpu.CompilerParams(
            dimension_semantics=("parallel", "parallel")),
        cost_estimate=pl.CostEstimate(flops=flops, transcendentals=0,
                                      bytes_accessed=bytes_accessed),
    )(w_taps, shift, xw)


# ------------------------------- JAX glue ----------------------------------- #

def adaptive_avg_pool3d(x, out_size):
    # Exact PyTorch AdaptiveAvgPool3d bin boundaries (static shapes).
    B, C, D, H, W = x.shape

    def bins(n):
        return [(int(math.floor(i * n / out_size)),
                 int(math.ceil((i + 1) * n / out_size))) for i in range(out_size)]

    vals = []
    for ds, de in bins(D):
        for hs, he in bins(H):
            for ws, we in bins(W):
                vals.append(jnp.mean(x[:, :, ds:de, hs:he, ws:we], axis=(2, 3, 4)))
    return jnp.stack(vals, axis=-1).reshape(B, C, out_size, out_size, out_size)


def route_func3d(x, w1, w2, w3, num_experts, out_channels):
    # sigmoid-activation branch of route_func3d
    B = x.shape[0]
    a1 = adaptive_avg_pool3d(x, 1)                           # (B, C, 1, 1, 1)
    a3 = adaptive_avg_pool3d(x, 3)                           # (B, C, 3, 3, 3)
    a1 = jnp.broadcast_to(a1, a3.shape)
    att = jnp.concatenate([a1, a3], axis=1)                  # (B, 2C, 3, 3, 3)
    h = jax.nn.relu(jnp.einsum('bcdhw,sc->bsdhw', att, w1))  # 1x1x1 conv, no bias
    h = jax.nn.relu(jnp.einsum('bsdhw,sdhw->bs', h, w2))     # depthwise 3x3x3 -> 1
    logits = jnp.einsum('bs,os->bo', h, w3)                  # 1x1x1 conv
    rw = jax.nn.sigmoid(logits)                              # (B, E*OC)
    return rw.reshape(B, num_experts, out_channels)


def coconv3d_forward(x, params, *, num_experts, out_channels,
                     kernel_size, stride, padding, tile_s_max=2048):
    B, C, D, H, W = x.shape
    OC, k, p = out_channels, kernel_size, padding
    E = num_experts

    rw = route_func3d(x, params['w1'], params['w2'], params['w3'], E, OC)  # (B,E,OC)

    # BatchNorm3d (eval mode, per expert) folded into a per-channel affine.
    eps = 1e-5
    bn_scale = params['bn_gamma'] / jnp.sqrt(params['bn_var'] + eps)   # (E, OC)
    bn_shift = params['bn_beta'] - params['bn_mean'] * bn_scale        # (E, OC)
    route_scale = rw * bn_scale[None]                                  # (B, E, OC)
    shift = jnp.sum(rw * bn_shift[None], axis=1)[:, :, None]           # (B, OC, 1)
    shift = shift.astype(jnp.float32)

    # Fold routing * BN scale into a per-batch effective weight (scale is
    # diagonal on OC), reorganized tap-major: (B, k^3, OC, C).
    w_eff = jnp.einsum('beo,eocdhw->bdhwoc', route_scale, params['convs'])
    w_taps = w_eff.reshape(B, k ** 3, OC, C)

    # Geometry on the zero-padded input grid.
    Dp, Hp, Wp = D + 2 * p, H + 2 * p, W + 2 * p
    Do = (D + 2 * p - k) // stride + 1
    Ho = (H + 2 * p - k) // stride + 1
    Wo = (W + 2 * p - k) // stride + 1
    Np = Dp * Hp * Wp                                  # flat padded grid size
    max_off = (k - 1) * (Hp * Wp + Wp + 1)             # largest tap offset

    Cp = _round_up(C, 8)                               # sublane-friendly channels
    tS = min(tile_s_max, _round_up(Np, 128))           # always a full, lane-dense tile
    ns_pad = _round_up(Np, tS)
    s_tiles = ns_pad // tS
    Lw = tS + _round_up(max_off, 128)                  # window = tile + halo
    nxf = ns_pad - tS + Lw                             # flat input length incl. halo

    # bf16 *before* padding; padded/flattened input built directly (no extra pass).
    xb = x.astype(jnp.bfloat16)
    xpz = jnp.pad(xb, ((0, 0), (0, Cp - C), (p, p), (p, p), (p, p)))   # (B,Cp,Dp,Hp,Wp)
    x_flat = xpz.reshape(B, Cp, Np)
    x_flat = jnp.pad(x_flat, ((0, 0), (0, 0), (0, nxf - Np)))          # zero tail
    # Halo'd per-tile windows: ~(1 + max_off/tS)x duplication instead of k^3 x.
    xw = jnp.stack([x_flat[:, :, s * tS:s * tS + Lw] for s in range(s_tiles)],
                   axis=1)                                             # (B,St,Cp,Lw)

    w_taps = jnp.pad(w_taps, ((0, 0), (0, 0), (0, 0), (0, Cp - C))).astype(jnp.bfloat16)
    tap_offsets = tuple(kd * Hp * Wp + kh * Wp + kw
                        for kd in range(k) for kh in range(k) for kw in range(k))

    out_flat = coconv_pallas(w_taps, shift, xw,
                             tap_offsets=tap_offsets, tile_s=tS, ns_pad=ns_pad)

    # Crop: valid dense outputs live at flat index d*Hp*Wp + h*Wp + w of the
    # padded grid; strided outputs are the stride-subsampled dense outputs.
    out = out_flat[:, :, :Np].reshape(B, OC, Dp, Hp, Wp)
    out = out[:, :,
              0:(Do - 1) * stride + 1:stride,
              0:(Ho - 1) * stride + 1:stride,
              0:(Wo - 1) * stride + 1:stride]
    return out


def init_params(key, in_channels, out_channels, kernel_size, num_experts, reduction):
    sq = max(in_channels // reduction, reduction)
    k1, k2, k3, k4 = jax.random.split(key, 4)

    def kuniform(k, shape, fan_in):      # kaiming_uniform(a=sqrt(5)) -> U(-1/sqrt(fan_in), ..)
        bound = 1.0 / math.sqrt(fan_in)
        return jax.random.uniform(k, shape, jnp.float32, -bound, bound)

    convs = kuniform(k1, (num_experts, out_channels, in_channels,
                          kernel_size, kernel_size, kernel_size),
                     in_channels * kernel_size ** 3)
    w1 = kuniform(k2, (sq, 2 * in_channels), 2 * in_channels)
    w2 = kuniform(k3, (sq, 3, 3, 3), 27)
    w3 = kuniform(k4, (num_experts * out_channels, sq), sq)
    # Fresh BatchNorm3d (eval mode): gamma=1, beta=0, running_mean=0, running_var=1.
    bn_gamma = jnp.ones((num_experts, out_channels), jnp.float32)
    bn_beta = jnp.zeros((num_experts, out_channels), jnp.float32)
    bn_mean = jnp.zeros((num_experts, out_channels), jnp.float32)
    bn_var = jnp.ones((num_experts, out_channels), jnp.float32)
    return dict(convs=convs, w1=w1, w2=w2, w3=w3,
                bn_gamma=bn_gamma, bn_beta=bn_beta,
                bn_mean=bn_mean, bn_var=bn_var)


if __name__ == "__main__":
    # CoConv3d(in_channels=4, out_channels=8, kernel_size=3, num_experts=3,
    #          stride=1, padding=1, groups=1, reduction=16, bias=False,
    #          fuse_conv=False, activation='sigmoid')
    B, C, D, H, W = 2, 4, 6, 6, 6
    OC, KS, E = 8, 3, 3
    key = jax.random.PRNGKey(0)
    kx, kp = jax.random.split(key)
    x = jax.random.normal(kx, (B, C, D, H, W), jnp.float32)
    params = init_params(kp, C, OC, KS, E, 16)

    out = coconv3d_forward(x, params, num_experts=E, out_channels=OC,
                           kernel_size=KS, stride=1, padding=1)
    jax.block_until_ready(out)
    assert out.shape == (B, OC, D, H, W), out.shape
    assert bool(jnp.all(jnp.isfinite(out)))
    print("KERNEL_OK")
</pallas_src>

<mosaic_0001>
module attributes {stable_mosaic.version = 11 : i64} {
  func.func @_coconv_tap_kernel(%arg0: i32, %arg1: i32, %arg2: memref<1x27x8x8xbf16, #tpu.memory_space<vmem>>, %arg3: memref<1x8x1xf32, #tpu.memory_space<vmem>>, %arg4: memref<1x1x8x768xbf16, #tpu.memory_space<vmem>>, %arg5: memref<1x8x512xf32, #tpu.memory_space<vmem>>) attributes {dimension_semantics = [#tpu.dimension_semantics<parallel>, #tpu.dimension_semantics<parallel>], iteration_bounds = array<i64: 2, 1>, scalar_prefetch = 0 : i64, scratch_operands = 0 : i64, tpu.core_type = #tpu.core_type<tc>, window_params = [{transform_indices = @transform_0, window_bounds = array<i64: 1, 27, 8, 8>}, {transform_indices = @transform_1, window_bounds = array<i64: 1, 8, 1>}, {transform_indices = @transform_2, window_bounds = array<i64: 1, 1, 8, 768>}, {transform_indices = @transform_3, window_bounds = array<i64: 1, 8, 512>}]} {
    %c0 = arith.constant 0 : index
    %c0_0 = arith.constant 0 : index
    %c0_1 = arith.constant 0 : index
    %c0_2 = arith.constant 0 : index
    %0 = vector.load %arg4[%c0, %c0_0, %c0_1, %c0_2] : memref<1x1x8x768xbf16, #tpu.memory_space<vmem>>, vector<1x1x8x768xbf16>
    %1 = vector.shape_cast %0 : vector<1x1x8x768xbf16> to vector<8x768xbf16>
    %c0_3 = arith.constant 0 : index
    %c0_4 = arith.constant 0 : index
    %c0_5 = arith.constant 0 : index
    %2 = vector.load %arg3[%c0_3, %c0_4, %c0_5] : memref<1x8x1xf32, #tpu.memory_space<vmem>>, vector<1x8x1xf32>
    %3 = vector.shape_cast %2 : vector<1x8x1xf32> to vector<8x1xf32>
    %4 = vector.shape_cast %3 : vector<8x1xf32> to vector<8x1xf32>
    %5 = vector.broadcast %4 : vector<8x1xf32> to vector<8x512xf32>
    %6 = vector.extract_strided_slice %1 {offsets = [0, 0], sizes = [8, 512], strides = [1, 1]} : vector<8x768xbf16> to vector<8x512xbf16>
    %c0_6 = arith.constant 0 : index
    %c0_7 = arith.constant 0 : index
    %c0_8 = arith.constant 0 : index
    %c0_9 = arith.constant 0 : index
    %7 = vector.load %arg2[%c0_6, %c0_7, %c0_8, %c0_9] : memref<1x27x8x8xbf16, #tpu.memory_space<vmem>>, vector<1x1x8x8xbf16>
    %8 = vector.shape_cast %7 : vector<1x1x8x8xbf16> to vector<8x8xbf16>
    %cst = arith.constant dense<0.000000e+00> : vector<8x512xf32>
    %9 = tpu.matmul %8, %6, %cst {dimension_numbers = #tpu.dot_dimension_numbers<[1], [0], [0], [1], [0, 0, 1, 1], [], []>} : vector<8x8xbf16>, vector<8x512xbf16>, vector<8x512xf32> -> vector<8x512xf32>
    %10 = arith.addf %5, %9 : vector<8x512xf32>
    %11 = vector.extract_strided_slice %1 {offsets = [0, 1], sizes = [8, 512], strides = [1, 1]} : vector<8x768xbf16> to vector<8x512xbf16>
    %c0_10 = arith.constant 0 : index
    %c1 = arith.constant 1 : index
    %c0_11 = arith.constant 0 : index
    %c0_12 = arith.constant 0 : index
    %12 = vector.load %arg2[%c0_10, %c1, %c0_11, %c0_12] : memref<1x27x8x8xbf16, #tpu.memory_space<vmem>>, vector<1x1x8x8xbf16>
    %13 = vector.shape_cast %12 : vector<1x1x8x8xbf16> to vector<8x8xbf16>
    %cst_13 = arith.constant dense<0.000000e+00> : vector<8x512xf32>
    %14 = tpu.matmul %13, %11, %cst_13 {dimension_numbers = #tpu.dot_dimension_numbers<[1], [0], [0], [1], [0, 0, 1, 1], [], []>} : vector<8x8xbf16>, vector<8x512xbf16>, vector<8x512xf32> -> vector<8x512xf32>
    %15 = arith.addf %10, %14 : vector<8x512xf32>
    %16 = vector.extract_strided_slice %1 {offsets = [0, 2], sizes = [8, 512], strides = [1, 1]} : vector<8x768xbf16> to vector<8x512xbf16>
    %c0_14 = arith.constant 0 : index
    %c2 = arith.constant 2 : index
    %c0_15 = arith.constant 0 : index
    %c0_16 = arith.constant 0 : index
    %17 = vector.load %arg2[%c0_14, %c2, %c0_15, %c0_16] : memref<1x27x8x8xbf16, #tpu.memory_space<vmem>>, vector<1x1x8x8xbf16>
    %18 = vector.shape_cast %17 : vector<1x1x8x8xbf16> to vector<8x8xbf16>
    %cst_17 = arith.constant dense<0.000000e+00> : vector<8x512xf32>
    %19 = tpu.matmul %18, %16, %cst_17 {dimension_numbers = #tpu.dot_dimension_numbers<[1], [0], [0], [1], [0, 0, 1, 1], [], []>} : vector<8x8xbf16>, vector<8x512xbf16>, vector<8x512xf32> -> vector<8x512xf32>
    %20 = arith.addf %15, %19 : vector<8x512xf32>
    %21 = vector.extract_strided_slice %1 {offsets = [0, 8], sizes = [8, 512], strides = [1, 1]} : vector<8x768xbf16> to vector<8x512xbf16>
    %c0_18 = arith.constant 0 : index
    %c3 = arith.constant 3 : index
    %c0_19 = arith.constant 0 : index
    %c0_20 = arith.constant 0 : index
    %22 = vector.load %arg2[%c0_18, %c3, %c0_19, %c0_20] : memref<1x27x8x8xbf16, #tpu.memory_space<vmem>>, vector<1x1x8x8xbf16>
    %23 = vector.shape_cast %22 : vector<1x1x8x8xbf16> to vector<8x8xbf16>
    %cst_21 = arith.constant dense<0.000000e+00> : vector<8x512xf32>
    %24 = tpu.matmul %23, %21, %cst_21 {dimension_numbers = #tpu.dot_dimension_numbers<[1], [0], [0], [1], [0, 0, 1, 1], [], []>} : vector<8x8xbf16>, vector<8x512xbf16>, vector<8x512xf32> -> vector<8x512xf32>
    %25 = arith.addf %20, %24 : vector<8x512xf32>
    %26 = vector.extract_strided_slice %1 {offsets = [0, 9], sizes = [8, 512], strides = [1, 1]} : vector<8x768xbf16> to vector<8x512xbf16>
    %c0_22 = arith.constant 0 : index
    %c4 = arith.constant 4 : index
    %c0_23 = arith.constant 0 : index
    %c0_24 = arith.constant 0 : index
    %27 = vector.load %arg2[%c0_22, %c4, %c0_23, %c0_24] : memref<1x27x8x8xbf16, #tpu.memory_space<vmem>>, vector<1x1x8x8xbf16>
    %28 = vector.shape_cast %27 : vector<1x1x8x8xbf16> to vector<8x8xbf16>
    %cst_25 = arith.constant dense<0.000000e+00> : vector<8x512xf32>
    %29 = tpu.matmul %28, %26, %cst_25 {dimension_numbers = #tpu.dot_dimension_numbers<[1], [0], [0], [1], [0, 0, 1, 1], [], []>} : vector<8x8xbf16>, vector<8x512xbf16>, vector<8x512xf32> -> vector<8x512xf32>
    %30 = arith.addf %25, %29 : vector<8x512xf32>
    %31 = vector.extract_strided_slice %1 {offsets = [0, 10], sizes = [8, 512], strides = [1, 1]} : vector<8x768xbf16> to vector<8x512xbf16>
    %c0_26 = arith.constant 0 : index
    %c5 = arith.constant 5 : index
    %c0_27 = arith.constant 0 : index
    %c0_28 = arith.constant 0 : index
    %32 = vector.load %arg2[%c0_26, %c5, %c0_27, %c0_28] : memref<1x27x8x8xbf16, #tpu.memory_space<vmem>>, vector<1x1x8x8xbf16>
    %33 = vector.shape_cast %32 : vector<1x1x8x8xbf16> to vector<8x8xbf16>
    %cst_29 = arith.constant dense<0.000000e+00> : vector<8x512xf32>
    %34 = tpu.matmul %33, %31, %cst_29 {dimension_numbers = #tpu.dot_dimension_numbers<[1], [0], [0], [1], [0, 0, 1, 1], [], []>} : vector<8x8xbf16>, vector<8x512xbf16>, vector<8x512xf32> -> vector<8x512xf32>
    %35 = arith.addf %30, %34 : vector<8x512xf32>
    %36 = vector.extract_strided_slice %1 {offsets = [0, 16], sizes = [8, 512], strides = [1, 1]} : vector<8x768xbf16> to vector<8x512xbf16>
    %c0_30 = arith.constant 0 : index
    %c6 = arith.constant 6 : index
    %c0_31 = arith.constant 0 : index
    %c0_32 = arith.constant 0 : index
    %37 = vector.load %arg2[%c0_30, %c6, %c0_31, %c0_32] : memref<1x27x8x8xbf16, #tpu.memory_space<vmem>>, vector<1x1x8x8xbf16>
    %38 = vector.shape_cast %37 : vector<1x1x8x8xbf16> to vector<8x8xbf16>
    %cst_33 = arith.constant dense<0.000000e+00> : vector<8x512xf32>
    %39 = tpu.matmul %38, %36, %cst_33 {dimension_numbers = #tpu.dot_dimension_numbers<[1], [0], [0], [1], [0, 0, 1, 1], [], []>} : vector<8x8xbf16>, vector<8x512xbf16>, vector<8x512xf32> -> vector<8x512xf32>
    %40 = arith.addf %35, %39 : vector<8x512xf32>
    %41 = vector.extract_strided_slice %1 {offsets = [0, 17], sizes = [8, 512], strides = [1, 1]} : vector<8x768xbf16> to vector<8x512xbf16>
    %c0_34 = arith.constant 0 : index
    %c7 = arith.constant 7 : index
    %c0_35 = arith.constant 0 : index
    %c0_36 = arith.constant 0 : index
    %42 = vector.load %arg2[%c0_34, %c7, %c0_35, %c0_36] : memref<1x27x8x8xbf16, #tpu.memory_space<vmem>>, vector<1x1x8x8xbf16>
    %43 = vector.shape_cast %42 : vector<1x1x8x8xbf16> to vector<8x8xbf16>
    %cst_37 = arith.constant dense<0.000000e+00> : vector<8x512xf32>
    %44 = tpu.matmul %43, %41, %cst_37 {dimension_numbers = #tpu.dot_dimension_numbers<[1], [0], [0], [1], [0, 0, 1, 1], [], []>} : vector<8x8xbf16>, vector<8x512xbf16>, vector<8x512xf32> -> vector<8x512xf32>
    %45 = arith.addf %40, %44 : vector<8x512xf32>
    %46 = vector.extract_strided_slice %1 {offsets = [0, 18], sizes = [8, 512], strides = [1, 1]} : vector<8x768xbf16> to vector<8x512xbf16>
    %c0_38 = arith.constant 0 : index
    %c8 = arith.constant 8 : index
    %c0_39 = arith.constant 0 : index
    %c0_40 = arith.constant 0 : index
    %47 = vector.load %arg2[%c0_38, %c8, %c0_39, %c0_40] : memref<1x27x8x8xbf16, #tpu.memory_space<vmem>>, vector<1x1x8x8xbf16>
    %48 = vector.shape_cast %47 : vector<1x1x8x8xbf16> to vector<8x8xbf16>
    %cst_41 = arith.constant dense<0.000000e+00> : vector<8x512xf32>
    %49 = tpu.matmul %48, %46, %cst_41 {dimension_numbers = #tpu.dot_dimension_numbers<[1], [0], [0], [1], [0, 0, 1, 1], [], []>} : vector<8x8xbf16>, vector<8x512xbf16>, vector<8x512xf32> -> vector<8x512xf32>
    %50 = arith.addf %45, %49 : vector<8x512xf32>
    %51 = vector.extract_strided_slice %1 {offsets = [0, 64], sizes = [8, 512], strides = [1, 1]} : vector<8x768xbf16> to vector<8x512xbf16>
    %c0_42 = arith.constant 0 : index
    %c9 = arith.constant 9 : index
    %c0_43 = arith.constant 0 : index
    %c0_44 = arith.constant 0 : index
    %52 = vector.load %arg2[%c0_42, %c9, %c0_43, %c0_44] : memref<1x27x8x8xbf16, #tpu.memory_space<vmem>>, vector<1x1x8x8xbf16>
    %53 = vector.shape_cast %52 : vector<1x1x8x8xbf16> to vector<8x8xbf16>
    %cst_45 = arith.constant dense<0.000000e+00> : vector<8x512xf32>
    %54 = tpu.matmul %53, %51, %cst_45 {dimension_numbers = #tpu.dot_dimension_numbers<[1], [0], [0], [1], [0, 0, 1, 1], [], []>} : vector<8x8xbf16>, vector<8x512xbf16>, vector<8x512xf32> -> vector<8x512xf32>
    %55 = arith.addf %50, %54 : vector<8x512xf32>
    %56 = vector.extract_strided_slice %1 {offsets = [0, 65], sizes = [8, 512], strides = [1, 1]} : vector<8x768xbf16> to vector<8x512xbf16>
    %c0_46 = arith.constant 0 : index
    %c10 = arith.constant 10 : index
    %c0_47 = arith.constant 0 : index
    %c0_48 = arith.constant 0 : index
    %57 = vector.load %arg2[%c0_46, %c10, %c0_47, %c0_48] : memref<1x27x8x8xbf16, #tpu.memory_space<vmem>>, vector<1x1x8x8xbf16>
    %58 = vector.shape_cast %57 : vector<1x1x8x8xbf16> to vector<8x8xbf16>
    %cst_49 = arith.constant dense<0.000000e+00> : vector<8x512xf32>
    %59 = tpu.matmul %58, %56, %cst_49 {dimension_numbers = #tpu.dot_dimension_numbers<[1], [0], [0], [1], [0, 0, 1, 1], [], []>} : vector<8x8xbf16>, vector<8x512xbf16>, vector<8x512xf32> -> vector<8x512xf32>
    %60 = arith.addf %55, %59 : vector<8x512xf32>
    %61 = vector.extract_strided_slice %1 {offsets = [0, 66], sizes = [8, 512], strides = [1, 1]} : vector<8x768xbf16> to vector<8x512xbf16>
    %c0_50 = arith.constant 0 : index
    %c11 = arith.constant 11 : index
    %c0_51 = arith.constant 0 : index
    %c0_52 = arith.constant 0 : index
    %62 = vector.load %arg2[%c0_50, %c11, %c0_51, %c0_52] : memref<1x27x8x8xbf16, #tpu.memory_space<vmem>>, vector<1x1x8x8xbf16>
    %63 = vector.shape_cast %62 : vector<1x1x8x8xbf16> to vector<8x8xbf16>
    %cst_53 = arith.constant dense<0.000000e+00> : vector<8x512xf32>
    %64 = tpu.matmul %63, %61, %cst_53 {dimension_numbers = #tpu.dot_dimension_numbers<[1], [0], [0], [1], [0, 0, 1, 1], [], []>} : vector<8x8xbf16>, vector<8x512xbf16>, vector<8x512xf32> -> vector<8x512xf32>
    %65 = arith.addf %60, %64 : vector<8x512xf32>
    %66 = vector.extract_strided_slice %1 {offsets = [0, 72], sizes = [8, 512], strides = [1, 1]} : vector<8x768xbf16> to vector<8x512xbf16>
    %c0_54 = arith.constant 0 : index
    %c12 = arith.constant 12 : index
    %c0_55 = arith.constant 0 : index
    %c0_56 = arith.constant 0 : index
    %67 = vector.load %arg2[%c0_54, %c12, %c0_55, %c0_56] : memref<1x27x8x8xbf16, #tpu.memory_space<vmem>>, vector<1x1x8x8xbf16>
    %68 = vector.shape_cast %67 : vector<1x1x8x8xbf16> to vector<8x8xbf16>
    %cst_57 = arith.constant dense<0.000000e+00> : vector<8x512xf32>
    %69 = tpu.matmul %68, %66, %cst_57 {dimension_numbers = #tpu.dot_dimension_numbers<[1], [0], [0], [1], [0, 0, 1, 1], [], []>} : vector<8x8xbf16>, vector<8x512xbf16>, vector<8x512xf32> -> vector<8x512xf32>
    %70 = arith.addf %65, %69 : vector<8x512xf32>
    %71 = vector.extract_strided_slice %1 {offsets = [0, 73], sizes = [8, 512], strides = [1, 1]} : vector<8x768xbf16> to vector<8x512xbf16>
    %c0_58 = arith.constant 0 : index
    %c13 = arith.constant 13 : index
    %c0_59 = arith.constant 0 : index
    %c0_60 = arith.constant 0 : index
    %72 = vector.load %arg2[%c0_58, %c13, %c0_59, %c0_60] : memref<1x27x8x8xbf16, #tpu.memory_space<vmem>>, vector<1x1x8x8xbf16>
    %73 = vector.shape_cast %72 : vector<1x1x8x8xbf16> to vector<8x8xbf16>
    %cst_61 = arith.constant dense<0.000000e+00> : vector<8x512xf32>
    %74 = tpu.matmul %73, %71, %cst_61 {dimension_numbers = #tpu.dot_dimension_numbers<[1], [0], [0], [1], [0, 0, 1, 1], [], []>} : vector<8x8xbf16>, vector<8x512xbf16>, vector<8x512xf32> -> vector<8x512xf32>
    %75 = arith.addf %70, %74 : vector<8x512xf32>
    %76 = vector.extract_strided_slice %1 {offsets = [0, 74], sizes = [8, 512], strides = [1, 1]} : vector<8x768xbf16> to vector<8x512xbf16>
    %c0_62 = arith.constant 0 : index
    %c14 = arith.constant 14 : index
    %c0_63 = arith.constant 0 : index
    %c0_64 = arith.constant 0 : index
    %77 = vector.load %arg2[%c0_62, %c14, %c0_63, %c0_64] : memref<1x27x8x8xbf16, #tpu.memory_space<vmem>>, vector<1x1x8x8xbf16>
    %78 = vector.shape_cast %77 : vector<1x1x8x8xbf16> to vector<8x8xbf16>
    %cst_65 = arith.constant dense<0.000000e+00> : vector<8x512xf32>
    %79 = tpu.matmul %78, %76, %cst_65 {dimension_numbers = #tpu.dot_dimension_numbers<[1], [0], [0], [1], [0, 0, 1, 1], [], []>} : vector<8x8xbf16>, vector<8x512xbf16>, vector<8x512xf32> -> vector<8x512xf32>
    %80 = arith.addf %75, %79 : vector<8x512xf32>
    %81 = vector.extract_strided_slice %1 {offsets = [0, 80], sizes = [8, 512], strides = [1, 1]} : vector<8x768xbf16> to vector<8x512xbf16>
    %c0_66 = arith.constant 0 : index
    %c15 = arith.constant 15 : index
    %c0_67 = arith.constant 0 : index
    %c0_68 = arith.constant 0 : index
    %82 = vector.load %arg2[%c0_66, %c15, %c0_67, %c0_68] : memref<1x27x8x8xbf16, #tpu.memory_space<vmem>>, vector<1x1x8x8xbf16>
    %83 = vector.shape_cast %82 : vector<1x1x8x8xbf16> to vector<8x8xbf16>
    %cst_69 = arith.constant dense<0.000000e+00> : vector<8x512xf32>
    %84 = tpu.matmul %83, %81, %cst_69 {dimension_numbers = #tpu.dot_dimension_numbers<[1], [0], [0], [1], [0, 0, 1, 1], [], []>} : vector<8x8xbf16>, vector<8x512xbf16>, vector<8x512xf32> -> vector<8x512xf32>
    %85 = arith.addf %80, %84 : vector<8x512xf32>
    %86 = vector.extract_strided_slice %1 {offsets = [0, 81], sizes = [8, 512], strides = [1, 1]} : vector<8x768xbf16> to vector<8x512xbf16>
    %c0_70 = arith.constant 0 : index
    %c16 = arith.constant 16 : index
    %c0_71 = arith.constant 0 : index
    %c0_72 = arith.constant 0 : index
    %87 = vector.load %arg2[%c0_70, %c16, %c0_71, %c0_72] : memref<1x27x8x8xbf16, #tpu.memory_space<vmem>>, vector<1x1x8x8xbf16>
    %88 = vector.shape_cast %87 : vector<1x1x8x8xbf16> to vector<8x8xbf16>
    %cst_73 = arith.constant dense<0.000000e+00> : vector<8x512xf32>
    %89 = tpu.matmul %88, %86, %cst_73 {dimension_numbers = #tpu.dot_dimension_numbers<[1], [0], [0], [1], [0, 0, 1, 1], [], []>} : vector<8x8xbf16>, vector<8x512xbf16>, vector<8x512xf32> -> vector<8x512xf32>
    %90 = arith.addf %85, %89 : vector<8x512xf32>
    %91 = vector.extract_strided_slice %1 {offsets = [0, 82], sizes = [8, 512], strides = [1, 1]} : vector<8x768xbf16> to vector<8x512xbf16>
    %c0_74 = arith.constant 0 : index
    %c17 = arith.constant 17 : index
    %c0_75 = arith.constant 0 : index
    %c0_76 = arith.constant 0 : index
    %92 = vector.load %arg2[%c0_74, %c17, %c0_75, %c0_76] : memref<1x27x8x8xbf16, #tpu.memory_space<vmem>>, vector<1x1x8x8xbf16>
    %93 = vector.shape_cast %92 : vector<1x1x8x8xbf16> to vector<8x8xbf16>
    %cst_77 = arith.constant dense<0.000000e+00> : vector<8x512xf32>
    %94 = tpu.matmul %93, %91, %cst_77 {dimension_numbers = #tpu.dot_dimension_numbers<[1], [0], [0], [1], [0, 0, 1, 1], [], []>} : vector<8x8xbf16>, vector<8x512xbf16>, vector<8x512xf32> -> vector<8x512xf32>
    %95 = arith.addf %90, %94 : vector<8x512xf32>
    %96 = vector.extract_strided_slice %1 {offsets = [0, 128], sizes = [8, 512], strides = [1, 1]} : vector<8x768xbf16> to vector<8x512xbf16>
    %c0_78 = arith.constant 0 : index
    %c18 = arith.constant 18 : index
    %c0_79 = arith.constant 0 : index
    %c0_80 = arith.constant 0 : index
    %97 = vector.load %arg2[%c0_78, %c18, %c0_79, %c0_80] : memref<1x27x8x8xbf16, #tpu.memory_space<vmem>>, vector<1x1x8x8xbf16>
    %98 = vector.shape_cast %97 : vector<1x1x8x8xbf16> to vector<8x8xbf16>
    %cst_81 = arith.constant dense<0.000000e+00> : vector<8x512xf32>
    %99 = tpu.matmul %98, %96, %cst_81 {dimension_numbers = #tpu.dot_dimension_numbers<[1], [0], [0], [1], [0, 0, 1, 1], [], []>} : vector<8x8xbf16>, vector<8x512xbf16>, vector<8x512xf32> -> vector<8x512xf32>
    %100 = arith.addf %95, %99 : vector<8x512xf32>
    %101 = vector.extract_strided_slice %1 {offsets = [0, 129], sizes = [8, 512], strides = [1, 1]} : vector<8x768xbf16> to vector<8x512xbf16>
    %c0_82 = arith.constant 0 : index
    %c19 = arith.constant 19 : index
    %c0_83 = arith.constant 0 : index
    %c0_84 = arith.constant 0 : index
    %102 = vector.load %arg2[%c0_82, %c19, %c0_83, %c0_84] : memref<1x27x8x8xbf16, #tpu.memory_space<vmem>>, vector<1x1x8x8xbf16>
    %103 = vector.shape_cast %102 : vector<1x1x8x8xbf16> to vector<8x8xbf16>
    %cst_85 = arith.constant dense<0.000000e+00> : vector<8x512xf32>
    %104 = tpu.matmul %103, %101, %cst_85 {dimension_numbers = #tpu.dot_dimension_numbers<[1], [0], [0], [1], [0, 0, 1, 1], [], []>} : vector<8x8xbf16>, vector<8x512xbf16>, vector<8x512xf32> -> vector<8x512xf32>
    %105 = arith.addf %100, %104 : vector<8x512xf32>
    %106 = vector.extract_strided_slice %1 {offsets = [0, 130], sizes = [8, 512], strides = [1, 1]} : vector<8x768xbf16> to vector<8x512xbf16>
    %c0_86 = arith.constant 0 : index
    %c20 = arith.constant 20 : index
    %c0_87 = arith.constant 0 : index
    %c0_88 = arith.constant 0 : index
    %107 = vector.load %arg2[%c0_86, %c20, %c0_87, %c0_88] : memref<1x27x8x8xbf16, #tpu.memory_space<vmem>>, vector<1x1x8x8xbf16>
    %108 = vector.shape_cast %107 : vector<1x1x8x8xbf16> to vector<8x8xbf16>
    %cst_89 = arith.constant dense<0.000000e+00> : vector<8x512xf32>
    %109 = tpu.matmul %108, %106, %cst_89 {dimension_numbers = #tpu.dot_dimension_numbers<[1], [0], [0], [1], [0, 0, 1, 1], [], []>} : vector<8x8xbf16>, vector<8x512xbf16>, vector<8x512xf32> -> vector<8x512xf32>
    %110 = arith.addf %105, %109 : vector<8x512xf32>
    %111 = vector.extract_strided_slice %1 {offsets = [0, 136], sizes = [8, 512], strides = [1, 1]} : vector<8x768xbf16> to vector<8x512xbf16>
    %c0_90 = arith.constant 0 : index
    %c21 = arith.constant 21 : index
    %c0_91 = arith.constant 0 : index
    %c0_92 = arith.constant 0 : index
    %112 = vector.load %arg2[%c0_90, %c21, %c0_91, %c0_92] : memref<1x27x8x8xbf16, #tpu.memory_space<vmem>>, vector<1x1x8x8xbf16>
    %113 = vector.shape_cast %112 : vector<1x1x8x8xbf16> to vector<8x8xbf16>
    %cst_93 = arith.constant dense<0.000000e+00> : vector<8x512xf32>
    %114 = tpu.matmul %113, %111, %cst_93 {dimension_numbers = #tpu.dot_dimension_numbers<[1], [0], [0], [1], [0, 0, 1, 1], [], []>} : vector<8x8xbf16>, vector<8x512xbf16>, vector<8x512xf32> -> vector<8x512xf32>
    %115 = arith.addf %110, %114 : vector<8x512xf32>
    %116 = vector.extract_strided_slice %1 {offsets = [0, 137], sizes = [8, 512], strides = [1, 1]} : vector<8x768xbf16> to vector<8x512xbf16>
    %c0_94 = arith.constant 0 : index
    %c22 = arith.constant 22 : index
    %c0_95 = arith.constant 0 : index
    %c0_96 = arith.constant 0 : index
    %117 = vector.load %arg2[%c0_94, %c22, %c0_95, %c0_96] : memref<1x27x8x8xbf16, #tpu.memory_space<vmem>>, vector<1x1x8x8xbf16>
    %118 = vector.shape_cast %117 : vector<1x1x8x8xbf16> to vector<8x8xbf16>
    %cst_97 = arith.constant dense<0.000000e+00> : vector<8x512xf32>
    %119 = tpu.matmul %118, %116, %cst_97 {dimension_numbers = #tpu.dot_dimension_numbers<[1], [0], [0], [1], [0, 0, 1, 1], [], []>} : vector<8x8xbf16>, vector<8x512xbf16>, vector<8x512xf32> -> vector<8x512xf32>
    %120 = arith.addf %115, %119 : vector<8x512xf32>
    %121 = vector.extract_strided_slice %1 {offsets = [0, 138], sizes = [8, 512], strides = [1, 1]} : vector<8x768xbf16> to vector<8x512xbf16>
    %c0_98 = arith.constant 0 : index
    %c23 = arith.constant 23 : index
    %c0_99 = arith.constant 0 : index
    %c0_100 = arith.constant 0 : index
    %122 = vector.load %arg2[%c0_98, %c23, %c0_99, %c0_100] : memref<1x27x8x8xbf16, #tpu.memory_space<vmem>>, vector<1x1x8x8xbf16>
    %123 = vector.shape_cast %122 : vector<1x1x8x8xbf16> to vector<8x8xbf16>
    %cst_101 = arith.constant dense<0.000000e+00> : vector<8x512xf32>
    %124 = tpu.matmul %123, %121, %cst_101 {dimension_numbers = #tpu.dot_dimension_numbers<[1], [0], [0], [1], [0, 0, 1, 1], [], []>} : vector<8x8xbf16>, vector<8x512xbf16>, vector<8x512xf32> -> vector<8x512xf32>
    %125 = arith.addf %120, %124 : vector<8x512xf32>
    %126 = vector.extract_strided_slice %1 {offsets = [0, 144], sizes = [8, 512], strides = [1, 1]} : vector<8x768xbf16> to vector<8x512xbf16>
    %c0_102 = arith.constant 0 : index
    %c24 = arith.constant 24 : index
    %c0_103 = arith.constant 0 : index
    %c0_104 = arith.constant 0 : index
    %127 = vector.load %arg2[%c0_102, %c24, %c0_103, %c0_104] : memref<1x27x8x8xbf16, #tpu.memory_space<vmem>>, vector<1x1x8x8xbf16>
    %128 = vector.shape_cast %127 : vector<1x1x8x8xbf16> to vector<8x8xbf16>
    %cst_105 = arith.constant dense<0.000000e+00> : vector<8x512xf32>
    %129 = tpu.matmul %128, %126, %cst_105 {dimension_numbers = #tpu.dot_dimension_numbers<[1], [0], [0], [1], [0, 0, 1, 1], [], []>} : vector<8x8xbf16>, vector<8x512xbf16>, vector<8x512xf32> -> vector<8x512xf32>
    %130 = arith.addf %125, %129 : vector<8x512xf32>
    %131 = vector.extract_strided_slice %1 {offsets = [0, 145], sizes = [8, 512], strides = [1, 1]} : vector<8x768xbf16> to vector<8x512xbf16>
    %c0_106 = arith.constant 0 : index
    %c25 = arith.constant 25 : index
    %c0_107 = arith.constant 0 : index
    %c0_108 = arith.constant 0 : index
    %132 = vector.load %arg2[%c0_106, %c25, %c0_107, %c0_108] : memref<1x27x8x8xbf16, #tpu.memory_space<vmem>>, vector<1x1x8x8xbf16>
    %133 = vector.shape_cast %132 : vector<1x1x8x8xbf16> to vector<8x8xbf16>
    %cst_109 = arith.constant dense<0.000000e+00> : vector<8x512xf32>
    %134 = tpu.matmul %133, %131, %cst_109 {dimension_numbers = #tpu.dot_dimension_numbers<[1], [0], [0], [1], [0, 0, 1, 1], [], []>} : vector<8x8xbf16>, vector<8x512xbf16>, vector<8x512xf32> -> vector<8x512xf32>
    %135 = arith.addf %130, %134 : vector<8x512xf32>
    %136 = vector.extract_strided_slice %1 {offsets = [0, 146], sizes = [8, 512], strides = [1, 1]} : vector<8x768xbf16> to vector<8x512xbf16>
    %c0_110 = arith.constant 0 : index
    %c26 = arith.constant 26 : index
    %c0_111 = arith.constant 0 : index
    %c0_112 = arith.constant 0 : index
    %137 = vector.load %arg2[%c0_110, %c26, %c0_111, %c0_112] : memref<1x27x8x8xbf16, #tpu.memory_space<vmem>>, vector<1x1x8x8xbf16>
    %138 = vector.shape_cast %137 : vector<1x1x8x8xbf16> to vector<8x8xbf16>
    %cst_113 = arith.constant dense<0.000000e+00> : vector<8x512xf32>
    %139 = tpu.matmul %138, %136, %cst_113 {dimension_numbers = #tpu.dot_dimension_numbers<[1], [0], [0], [1], [0, 0, 1, 1], [], []>} : vector<8x8xbf16>, vector<8x512xbf16>, vector<8x512xf32> -> vector<8x512xf32>
    %140 = arith.addf %135, %139 : vector<8x512xf32>
    %c0_114 = arith.constant 0 : index
    %c0_115 = arith.constant 0 : index
    %c0_116 = arith.constant 0 : index
    %141 = vector.load %arg5[%c0_114, %c0_115, %c0_116] : memref<1x8x512xf32, #tpu.memory_space<vmem>>, vector<1x8x512xf32>
    %142 = vector.shape_cast %141 : vector<1x8x512xf32> to vector<8x512xf32>
    %143 = vector.shape_cast %140 : vector<8x512xf32> to vector<1x8x512xf32>
    tpu.vector_store %arg5[%c0_114, %c0_115, %c0_116], %143 {strides = array<i32>} : memref<1x8x512xf32, #tpu.memory_space<vmem>>, vector<1x8x512xf32>,
    return
  }
  func.func @transform_0(%arg0: i32, %arg1: i32) -> (i32, i32, i32, i32) {
    %c0_i32 = arith.constant 0 : i32
    %c0_i32_0 = arith.constant 0 : i32
    %c0_i32_1 = arith.constant 0 : i32
    %c0_i32_2 = arith.constant 0 : i32
    return %arg0, %c0_i32, %c0_i32_0, %c0_i32_1 : i32, i32, i32, i32
  }
  func.func @transform_1(%arg0: i32, %arg1: i32) -> (i32, i32, i32) {
    %c0_i32 = arith.constant 0 : i32
    %c0_i32_0 = arith.constant 0 : i32
    %c0_i32_1 = arith.constant 0 : i32
    return %arg0, %c0_i32, %c0_i32_0 : i32, i32, i32
  }
  func.func @transform_2(%arg0: i32, %arg1: i32) -> (i32, i32, i32, i32) {
    %c0_i32 = arith.constant 0 : i32
    %c0_i32_0 = arith.constant 0 : i32
    %c0_i32_1 = arith.constant 0 : i32
    return %arg0, %arg1, %c0_i32, %c0_i32_0 : i32, i32, i32, i32
  }
  func.func @transform_3(%arg0: i32, %arg1: i32) -> (i32, i32, i32) {
    %c0_i32 = arith.constant 0 : i32
    %c0_i32_0 = arith.constant 0 : i32
    return %arg0, %c0_i32, %arg1 : i32, i32, i32
  }
}

</mosaic_0001>

<bundles_post_ra>
// kernel: tpu_custom_call.1
= control target key start
LH: loop header
LB: loop body
LE: loop exit
PB: predicated region body
PF: predicated region fallthrough
CT: control target
= control target key end

     0   :  { %8 = vsyncpa [#allocation3], 0  ;;  %s3703_s0 = inlined_call_operand.vmem [shape: bf16[2,27,8,8], index: 0, kind: input, shape index: {}]   ;;  %s3704_s1 = inlined_call_operand.vmem [shape: f32[2,8,1], index: 1, kind: input, shape index: {}]   ;;  %s3705_s2 = inlined_call_operand.vmem [shape: bf16[2,1,8,768], index: 2, kind: input, shape index: {}]   ;;  %s3706_s3 = inlined_call_operand.hbm [shape: f32[2,8,512], index: 3, kind: output, shape index: {}]  }
   0x1   :  { %10 = vsyncpa [#allocation3 + $0x1], 0  ;;  %s2899_s12 = smov 0   ;;  %s2901_s13 = smov 0  }
   0x2   :  { %s2903_s14 = smov 0   ;;  %s2905_s15 = smov 0  }
   0x3   :  { %s2907_s16 = smov 0   ;;  %s2909_s17 = smov 0  }
   0x4 LB: > { %s2556_s18 = sadd.s32 4294967295, %s2859_s17   ;;  %s2557_s19 = sadd.s32 4294967294, %s2859_s17   ;;  %s2859_s17 = sphi %s2909_s17, %s16_s17   ;;  %s2855_s16 = sphi %s2907_s16, %s3770_s16   ;;  %s2851_s15 = sphi %s2905_s15, %s3769_s15   ;;  %s2847_s14 = sphi %s2903_s14, %s3768_s14   ;;  %s2843_s13 = sphi %s2901_s13, %s3767_s13   ;;  %s2839_s12 = sphi %s2899_s12, %s3766_s12  }
   0x5   : > { %s28_s20 = sadd.s32 1, %s2855_s16  ;;  %s117_s21 = sadd.s32 1, %s2847_s14 }
   0x6   : > { %p30_p0 = scmp.ge.s32.totalorder %s28_s20, 2  ;;  %p127_p1 = scmp.ne.s32.totalorder %s2847_s14, %s2843_s13 }
   0x7   : > { %p128_p2 = scmp.eq.s32.totalorder %s2556_s18, 1  ;;  %p133_p3 = scmp.ne.s32.totalorder %s2843_s13, %s2839_s12 }
   0x8   : > { %s3772_s20 = smov (%p30_p0, %s28_s20), 0  ;;  %p134_p5 = scmp.eq.s32.totalorder %s2557_s19, 1 }
   0x9   : > { %p2939_p4 = por %p128_p2, %p127_p1  ;;  %s112_s23 = ssub.s32 %s2855_s16, %s3772_s20 }
   0xa   : > { %p2560_p6 = scmp.ge.s32.totalorder %s2859_s17, 1  ;;  %p115_p7 = scmp.eq.s32.totalorder %s112_s23, 0 }
   0xb   : > { %p2946_p8 = por %p134_p5, %p133_p3  ;;  %p179_p9 = scmp.lt.s32.totalorder %s2859_s17, 3 }
   0xc   : > { %s2952_s25 = scalar_select %p115_p7, %s2847_s14, %s117_s21  }
   0xd   : > { %p180_p10 = pnand %p2560_p6, %p179_p9 }
   0xf   : > { %183 = sbr.rel (%p180_p10) target bundleno = 703 (0x2bf), region = 32 }
  0x14   : > { %p216_p11 = scmp.lt.s32.totalorder %s2851_s15, 1  ;;  %s2861_s4 = smov 127   ;;  %vm260_vm0 = vcmask 1043456   ;;  %vm256_vm1 = vcmask 64512   ;;  %vm344_vm2 = vcmask 1039360   ;;  %vm432_vm3 = vcmask 1031168  }
  0x15   : > { %s2862_s5 = smov 126   ;;  %s2863_s6 = smov 120   ;;  %vm520_vm4 = vcmask 982016   ;;  %vm608_vm5 = vcmask 973824   ;;  %vm696_vm6 = vcmask 965632   ;;  %vm784_vm7 = vcmask 916480  }
  0x16   : > { %s2956_s26 = scalar_select %p216_p11, %s2851_s15, 1  ;;  %vm872_vm8 = vcmask 908288   ;;  %vm960_vm9 = vcmask 900096   ;;  %vm1048_vm10 = vcmask 523264   ;;  %vm1136_vm11 = vcmask 515072  }
  0x17   : > { %s2864_s7 = smov 119   ;;  %s2865_s8 = smov 118   ;;  %vm1224_vm12 = vcmask 506880   ;;  %vm1312_vm13 = vcmask 457728   ;;  %vm1400_vm14 = vcmask 449536   ;;  %vm1488_vm15 = vcmask 441344  }
  0x18   : > { %s2706_s27 = smul.u32 24, %s2956_s26  ;;  %s2866_s9 = smov 112  }
  0x19   : > { %s2705_s10 = smul.u32 108, %s2956_s26  ;;  %s2867_s21 = smov 111  }
  0x1a   : > { %s233_s30 = scalar_lea.vmem %s3705_s2, %s2706_s27  ;;  %s2868_s23 = smov 110  }
  0x1b   : > { %v2962_v0 = vld [vmem:[%s233_s30 + $0x10] sm:$0xff]  ;;  %v237_v1 = vld [vmem:[%s233_s30 + $0x8] sm:$0xff]  ;;  %v236_v2 = vld [vmem:[%s233_s30] sm:$0xff]  ;;  %s3033_s19 = scalar_lea.vmem %s3703_s0, %s2705_s10  ;;  %s2869_s27 = smov 64  }
  0x1c   : > { %v332_v3 = vunpack.c.l.b16 %v2962_v0  ;;  %v250_v4 = vunpack.c.l.b16 %v237_v1  ;;  %v249_v5 = vunpack.c.h.b16 %v236_v2  ;;  %v251_v9 = vunpack.c.h.b16 %v237_v1  ;;  %v245_v15 = vld [vmem:[%s3033_s19] sm:$0xf]  ;;  %v2569_v26 = vld [vmem:[%s3033_s19 + $0x4] sm:$0xf]  ;;  %s2870_s28 = smov 63   ;;  %s2871_s29 = smov 62  }
  0x1d   : > { %v248_v10 = vunpack.c.l.b16 %v236_v2  ;;  %v2574_v54 = vld [vmem:[%s3033_s19 + $0x8] sm:$0xf]  ;;  %s2872_s30 = smov 56   ;;  %s2873_s10 = smov 55  }
  0x1e   : > { %v2965_v6 = vpack.c.b16 %v332_v3, %v332_v3  ;;  %v2967_v7 = vpack.c.b16 %v250_v4, %v250_v4  ;;  %v2969_v8 = vpack.c.b16 %v249_v5, %v249_v5  ;;  %v2977_v11 = vpack.c.b16 %v251_v9, %v251_v9  ;;  %v2579_v9 = vld [vmem:[%s3033_s19 + $0xc] sm:$0xf]  ;;  %s2874_s11 = smov 54   ;;  %s2875_s18 = smov 48  }
  0x1f   : > { %v2979_v12 = vpack.c.b16 %v248_v10, %v248_v10 }
  0x20   : > { %342 = vrot.lane.b32.xlu1 %v2965_v6, %s2861_s4  ;;  %338 = vrot.lane.b32.xlu0 %v2967_v7, %s2861_s4  ;;  %v3037_v13 = vsel %vm260_vm0, %v2967_v7, 0  ;;  %v3041_v14 = vsel %vm260_vm0, %v2977_v11, 0  ;;  %v3058_v17 = vsel %vm260_vm0, %v2969_v8, 0 }
  0x21   : > { %336 = vrot.lane.b32.xlu2 %v2969_v8, %s2861_s4  ;;  %306 = vmatpush.bf16.msra.mxu2 %v3037_v13  ;;  %v262_v16 = vsel %vm260_vm0, %v2979_v12, 0 }
  0x22   : > { %319 = vmatpush.bf16.msra.mxu3 %v3041_v14  ;;  %280 = vmatpush.bf16.msra.mxu0 %v262_v16 }
  0x23   : > { %293 = vmatpush.bf16.msra.mxu1 %v3058_v17 }
  0x24   : > { %2567 = vmatmul.msk.bf16.vlgmr.msra.gmra.mxu2 %vm256_vm1, %v245_v15 }
  0x25   : > { %2568 = vmatmul.msk.bf16.vlgmr.msra.gmra.mxu3 %vm256_vm1, %v245_v15  ;;  %2565 = vmatmul.msk.bf16.vlgmr.msra.gmra.mxu0 %vm256_vm1, %v245_v15 }
  0x26   : > { %2566 = vmatmul.msk.bf16.vlgmr.msra.gmra.mxu1 %vm256_vm1, %v245_v15 }
  0x28   : > { %340 = vrot.lane.b32.xlu0 %v2977_v11, %s2861_s4  ;;  %334 = vrot.lane.b32.xlu1 %v2979_v12, %s2861_s4 }
  0x29   : > { %426 = vrot.lane.b32.xlu2 %v2967_v7, %s2862_s5 }
  0x30   : > { %428 = vrot.lane.b32.xlu0 %v2977_v11, %s2862_s5  ;;  %430 = vrot.lane.b32.xlu1 %v2965_v6, %s2862_s5 }
  0x31   : > { %422 = vrot.lane.b32.xlu2 %v2979_v12, %s2862_s5 }
  0x38   : > { %424 = vrot.lane.b32.xlu0 %v2969_v8, %s2862_s5  ;;  %514 = vrot.lane.b32.xlu1 %v2967_v7, %s2863_s6 }
  0x39   : > { %516 = vrot.lane.b32.xlu2 %v2977_v11, %s2863_s6 }
  0x40   : > { %518 = vrot.lane.b32.xlu0 %v2965_v6, %s2863_s6  ;;  %510 = vrot.lane.b32.xlu1 %v2979_v12, %s2863_s6 }
  0x41   : > { %512 = vrot.lane.b32.xlu2 %v2969_v8, %s2863_s6 }
  0x48   : > { %602 = vrot.lane.b32.xlu0 %v2967_v7, %s2864_s7  ;;  %604 = vrot.lane.b32.xlu1 %v2977_v11, %s2864_s7 }
  0x49   : > { %606 = vrot.lane.b32.xlu2 %v2965_v6, %s2864_s7 }
  0x50   : > { %598 = vrot.lane.b32.xlu0 %v2979_v12, %s2864_s7  ;;  %600 = vrot.lane.b32.xlu1 %v2969_v8, %s2864_s7 }
  0x51   : > { %690 = vrot.lane.b32.xlu2 %v2967_v7, %s2865_s8 }
  0x58   : > { %692 = vrot.lane.b32.xlu0 %v2977_v11, %s2865_s8  ;;  %694 = vrot.lane.b32.xlu1 %v2965_v6, %s2865_s8 }
  0x59   : > { %686 = vrot.lane.b32.xlu2 %v2979_v12, %s2865_s8 }
  0x60   : > { %688 = vrot.lane.b32.xlu0 %v2969_v8, %s2865_s8  ;;  %778 = vrot.lane.b32.xlu1 %v2967_v7, %s2866_s9 }
  0x61   : > { %780 = vrot.lane.b32.xlu2 %v2977_v11, %s2866_s9 }
  0x68   : > { %782 = vrot.lane.b32.xlu0 %v2965_v6, %s2866_s9  ;;  %774 = vrot.lane.b32.xlu1 %v2979_v12, %s2866_s9 }
  0x69   : > { %776 = vrot.lane.b32.xlu2 %v2969_v8, %s2866_s9 }
  0x70   : > { %866 = vrot.lane.b32.xlu0 %v2967_v7, %s2867_s21  ;;  %868 = vrot.lane.b32.xlu1 %v2977_v11, %s2867_s21 }
  0x71   : > { %870 = vrot.lane.b32.xlu2 %v2965_v6, %s2867_s21 }
  0x78   : > { %862 = vrot.lane.b32.xlu0 %v2979_v12, %s2867_s21  ;;  %864 = vrot.lane.b32.xlu1 %v2969_v8, %s2867_s21 }
  0x79   : > { %954 = vrot.lane.b32.xlu2 %v2967_v7, %s2868_s23 }
  0x7b   : > { %v337_v18 = vpop.permute.xlu2 %336 }
  0x80   : > { %956 = vrot.lane.b32.xlu0 %v2977_v11, %s2868_s23  ;;  %958 = vrot.lane.b32.xlu1 %v2965_v6, %s2868_s23 }
  0x81   : > { %950 = vrot.lane.b32.xlu2 %v2979_v12, %s2868_s23 }
  0x83   : > { %v427_v19 = vpop.permute.xlu2 %426 }
  0x88   : > { %952 = vrot.lane.b32.xlu0 %v2969_v8, %s2868_s23  ;;  %1042 = vrot.lane.b32.xlu1 %v2967_v7, %s2869_s27 }
  0x89   : > { %1044 = vrot.lane.b32.xlu2 %v2977_v11, %s2869_s27 }
  0x8b   : > { %v423_v20 = vpop.permute.xlu2 %422 }
  0x90   : > { %1046 = vrot.lane.b32.xlu0 %v2965_v6, %s2869_s27  ;;  %1038 = vrot.lane.b32.xlu1 %v2979_v12, %s2869_s27 }
  0x91   : > { %1040 = vrot.lane.b32.xlu2 %v2969_v8, %s2869_s27  ;;  %s2876_s27 = smov 47  }
  0x92   : > { %v3088_v21 = vpop.permute.xlu1 %342  ;;  %v339_v22 = vpop.permute.xlu0 %338 }
  0x93   : > { %v3090_v23 = vpop.permute.xlu2 %516  ;;  %v346_v24 = vsel %vm344_vm2, %v337_v18, %v339_v22 }
  0x94   : > { %v3094_v25 = vsel %vm260_vm0, %v346_v24, 0 }
  0x95   : > { %384 = vmatpush.bf16.msrb.mxu1 %v3094_v25 }
  0x98   : > { %1130 = vrot.lane.b32.xlu0 %v2967_v7, %s2870_s28  ;;  %1132 = vrot.lane.b32.xlu1 %v2977_v11, %s2870_s28 }
  0x99   : > { %1134 = vrot.lane.b32.xlu2 %v2965_v6, %s2870_s28  ;;  %2571 = vmatmul.msk.bf16.vlgmr.msrb.gmra.mxu1 %vm256_vm1, %v2569_v26 }
  0x9a   : > { %v341_v27 = vpop.permute.xlu0 %340  ;;  %v335_v28 = vpop.permute.xlu1 %334 }
  0x9b   : > { %v513_v29 = vpop.permute.xlu2 %512  ;;  %v345_v30 = vsel %vm344_vm2, %v335_v28, %v337_v18  ;;  %v347_v31 = vsel %vm344_vm2, %v339_v22, %v341_v27  ;;  %v348_v32 = vsel %vm344_vm2, %v341_v27, %v3088_v21 }
  0x9c   : > { %v353_v33 = vsel %vm260_vm0, %v345_v30, 0  ;;  %v3108_v34 = vsel %vm260_vm0, %v347_v31, 0  ;;  %v3111_v35 = vsel %vm260_vm0, %v348_v32, 0  ;;  %v2584_v30 = vld [vmem:[%s3033_s19 + $0x10] sm:$0xf] }
  0x9d   : > { %371 = vmatpush.bf16.msrb.mxu0 %v353_v33  ;;  %397 = vmatpush.bf16.msrb.mxu2 %v3108_v34 }
  0x9e   : > { %410 = vmatpush.bf16.msrb.mxu3 %v3111_v35 }
  0xa0   : > { %1126 = vrot.lane.b32.xlu0 %v2979_v12, %s2870_s28  ;;  %1128 = vrot.lane.b32.xlu1 %v2969_v8, %s2870_s28  ;;  %s2877_s28 = smov 46  }
  0xa1   : > { %1218 = vrot.lane.b32.xlu2 %v2967_v7, %s2871_s29  ;;  %2570 = vmatmul.msk.bf16.vlgmr.msrb.gmra.mxu0 %vm256_vm1, %v2569_v26 }
  0xa2   : > { %2572 = vmatmul.msk.bf16.vlgmr.msrb.gmra.mxu2 %vm256_vm1, %v2569_v26  ;;  %2573 = vmatmul.msk.bf16.vlgmr.msrb.gmra.mxu3 %vm256_vm1, %v2569_v26  ;;  %v429_v36 = vpop.permute.xlu0 %428  ;;  %v3122_v37 = vpop.permute.xlu1 %430 }
  0xa3   : > { %v435_v38 = vsel %vm432_vm3, %v427_v19, %v429_v36  ;;  %v3125_v39 = vpop.permute.xlu2 %606  ;;  %v436_v40 = vsel %vm432_vm3, %v429_v36, %v3122_v37 }
  0xa4   : > { %v3130_v41 = vsel %vm260_vm0, %v435_v38, 0  ;;  %v3133_v42 = vsel %vm260_vm0, %v436_v40, 0 }
  0xa5   : > { %485 = vmatpush.bf16.msra.mxu2 %v3130_v41  ;;  %498 = vmatpush.bf16.msra.mxu3 %v3133_v42 }
  0xa8   : > { %1220 = vrot.lane.b32.xlu0 %v2977_v11, %s2871_s29  ;;  %1222 = vrot.lane.b32.xlu1 %v2965_v6, %s2871_s29 }
  0xa9   : > { %1214 = vrot.lane.b32.xlu2 %v2979_v12, %s2871_s29 }
  0xaa   : > { %v425_v43 = vpop.permute.xlu0 %424  ;;  %v515_v44 = vpop.permute.xlu1 %514 }
  0xab   : > { %v433_v45 = vsel %vm432_vm3, %v423_v20, %v425_v43  ;;  %v434_v46 = vsel %vm432_vm3, %v425_v43, %v427_v19  ;;  %v3145_v47 = vpop.permute.xlu2 %690  ;;  %v522_v48 = vsel %vm520_vm4, %v513_v29, %v515_v44  ;;  %v523_v49 = vsel %vm520_vm4, %v515_v44, %v3090_v23 }
  0xac   : > { %v441_v50 = vsel %vm260_vm0, %v433_v45, 0  ;;  %v3152_v51 = vsel %vm260_vm0, %v434_v46, 0  ;;  %v3155_v52 = vsel %vm260_vm0, %v522_v48, 0  ;;  %v3158_v53 = vsel %vm260_vm0, %v523_v49, 0 }
  0xad   : > { %459 = vmatpush.bf16.msra.mxu0 %v441_v50  ;;  %472 = vmatpush.bf16.msra.mxu1 %v3152_v51 }
  0xae   : > { %573 = vmatpush.bf16.msrb.mxu2 %v3158_v53 }
  0xb0   : > { %1216 = vrot.lane.b32.xlu0 %v2969_v8, %s2871_s29  ;;  %1306 = vrot.lane.b32.xlu1 %v2967_v7, %s2872_s30 }
  0xb1   : > { %560 = vmatpush.bf16.msrb.mxu1 %v3155_v52  ;;  %1308 = vrot.lane.b32.xlu2 %v2977_v11, %s2872_s30 }
  0xb2   : > { %2575 = vmatmul.msk.bf16.vlgmr.msra.gmra.mxu0 %vm256_vm1, %v2574_v54  ;;  %2576 = vmatmul.msk.bf16.vlgmr.msra.gmra.mxu1 %vm256_vm1, %v2574_v54  ;;  %v3171_v55 = vpop.permute.xlu0 %518  ;;  %v511_v56 = vpop.permute.xlu1 %510 }
  0xb3   : > { %2577 = vmatmul.msk.bf16.vlgmr.msra.gmra.mxu2 %vm256_vm1, %v2574_v54  ;;  %2578 = vmatmul.msk.bf16.vlgmr.msra.gmra.mxu3 %vm256_vm1, %v2574_v54  ;;  %v524_v57 = vsel %vm520_vm4, %v3090_v23, %v3171_v55  ;;  %v3177_v58 = vpop.permute.xlu2 %686  ;;  %v521_v59 = vsel %vm520_vm4, %v511_v56, %v513_v29 }
  0xb4   : > { %v3181_v60 = vsel %vm260_vm0, %v524_v57, 0  ;;  %v529_v61 = vsel %vm260_vm0, %v521_v59, 0  ;;  %v2589_v59 = vld [vmem:[%s3033_s19 + $0x14] sm:$0xf] }
  0xb5   : > { %586 = vmatpush.bf16.msrb.mxu3 %v3181_v60  ;;  %547 = vmatpush.bf16.msrb.mxu0 %v529_v61 }
  0xb8   : > { %1310 = vrot.lane.b32.xlu0 %v2965_v6, %s2872_s30  ;;  %1302 = vrot.lane.b32.xlu1 %v2979_v12, %s2872_s30 }
  0xb9   : > { %1304 = vrot.lane.b32.xlu2 %v2969_v8, %s2872_s30 }
  0xba   : > { %v603_v62 = vpop.permute.xlu0 %602  ;;  %v605_v63 = vpop.permute.xlu1 %604 }
  0xbb   : > { %v3188_v1 = vpop.permute.xlu2 %780  ;;  %v611_v2 = vsel %vm608_vm5, %v603_v62, %v605_v63  ;;  %v612_v3 = vsel %vm608_vm5, %v605_v63, %v3125_v39 }
  0xbc   : > { %v3194_v4 = vsel %vm260_vm0, %v611_v2, 0  ;;  %v3197_v5 = vsel %vm260_vm0, %v612_v3, 0 }
  0xbd   : > { %3728 = vst [vmem:[#allocation5_spill] sm:$0xff] %v3194_v4  ;;  %661 = vmatpush.bf16.msra.mxu2 %v3194_v4  ;;  %674 = vmatpush.bf16.msra.mxu3 %v3197_v5 }
  0xbe   : > { %3729 = vst [vmem:[#allocation6_spill] sm:$0xff] %v3197_v5 }
  0xc0   : > { %1394 = vrot.lane.b32.xlu0 %v2967_v7, %s2873_s10  ;;  %1396 = vrot.lane.b32.xlu1 %v2977_v11, %s2873_s10 }
  0xc1   : > { %1398 = vrot.lane.b32.xlu2 %v2965_v6, %s2873_s10 }
  0xc2   : > { %2580 = vmatmul.msk.bf16.vlgmr.msrb.gmra.mxu0 %vm256_vm1, %v2579_v9  ;;  %2581 = vmatmul.msk.bf16.vlgmr.msrb.gmra.mxu1 %vm256_vm1, %v2579_v9  ;;  %v599_v10 = vpop.permute.xlu0 %598  ;;  %v601_v15 = vpop.permute.xlu1 %600 }
  0xc3   : > { %2582 = vmatmul.msk.bf16.vlgmr.msrb.gmra.mxu2 %vm256_vm1, %v2579_v9  ;;  %2583 = vmatmul.msk.bf16.vlgmr.msrb.gmra.mxu3 %vm256_vm1, %v2579_v9  ;;  %v609_v16 = vsel %vm608_vm5, %v599_v10, %v601_v15  ;;  %v610_v18 = vsel %vm608_vm5, %v601_v15, %v603_v62  ;;  %v777_v22 = vpop.permute.xlu2 %776 }
  0xc4   : > { %v617_v19 = vsel %vm260_vm0, %v609_v16, 0  ;;  %v3213_v20 = vsel %vm260_vm0, %v610_v18, 0 }
  0xc5   : > { %3730 = vst [vmem:[#allocation7_spill] sm:$0xff] %v3213_v20  ;;  %648 = vmatpush.bf16.msra.mxu1 %v3213_v20  ;;  %635 = vmatpush.bf16.msra.mxu0 %v617_v19 }
  0xc8   : > { %1390 = vrot.lane.b32.xlu0 %v2979_v12, %s2873_s10  ;;  %1392 = vrot.lane.b32.xlu1 %v2969_v8, %s2873_s10 }
  0xc9   : > { %1482 = vrot.lane.b32.xlu2 %v2967_v7, %s2874_s11 }
  0xca   : > { %v693_v23 = vpop.permute.xlu0 %692  ;;  %v3220_v24 = vpop.permute.xlu1 %694 }
  0xcb   : > { %3731 = vst [vmem:[#allocation8_spill] sm:$0xff] %v3220_v24  ;;  %v699_v26 = vsel %vm696_vm6, %v3145_v47, %v693_v23  ;;  %v700_v27 = vsel %vm696_vm6, %v693_v23, %v3220_v24  ;;  %v3235_v31 = vpop.permute.xlu2 %870  ;;  %v3312_v23 = vpop.f32.mrf.mxu0 }
  0xcc   : > { %v3227_v28 = vsel %vm260_vm0, %v699_v26, 0  ;;  %v3230_v29 = vsel %vm260_vm0, %v700_v27, 0  ;;  %3734 = vst [vmem:[#allocation11_spill] sm:$0xff] %v3235_v31  ;;  %v3314_v26 = vpop.f32.mrf.mxu1 }
  0xcd   : > { %3732 = vst [vmem:[#allocation9_spill] sm:$0xff] %v3227_v28  ;;  %749 = vmatpush.bf16.msrb.mxu2 %v3227_v28  ;;  %762 = vmatpush.bf16.msrb.mxu3 %v3230_v29 }
  0xce   : > { %3733 = vst [vmem:[#allocation10_spill] sm:$0xff] %v3230_v29 }
  0xd0   : > { %1484 = vrot.lane.b32.xlu0 %v2977_v11, %s2874_s11  ;;  %1486 = vrot.lane.b32.xlu1 %v2965_v6, %s2874_s11 }
  0xd1   : > { %1478 = vrot.lane.b32.xlu2 %v2979_v12, %s2874_s11 }
  0xd2   : > { %2585 = vmatmul.msk.bf16.vlgmr.msra.gmra.mxu0 %vm256_vm1, %v2584_v30  ;;  %2586 = vmatmul.msk.bf16.vlgmr.msra.gmra.mxu1 %vm256_vm1, %v2584_v30  ;;  %v689_v32 = vpop.permute.xlu0 %688  ;;  %v779_v33 = vpop.permute.xlu1 %778 }
  0xd3   : > { %2587 = vmatmul.msk.bf16.vlgmr.msra.gmra.mxu2 %vm256_vm1, %v2584_v30  ;;  %2588 = vmatmul.msk.bf16.vlgmr.msra.gmra.mxu3 %vm256_vm1, %v2584_v30  ;;  %v697_v36 = vsel %vm696_vm6, %v3177_v58, %v689_v32  ;;  %v698_v38 = vsel %vm696_vm6, %v689_v32, %v3145_v47  ;;  %v786_v40 = vsel %vm784_vm7, %v777_v22, %v779_v33  ;;  %v3270_v47 = vpop.permute.xlu2 %954  ;;  %v2594_v30 = vld [vmem:[%s3033_s19 + $0x18] sm:$0xf]  ;;  %v3318_v32 = vpop.f32.mrf.mxu2 }
  0xd4   : > { %v787_v43 = vsel %vm784_vm7, %v779_v33, %v3188_v1  ;;  %v705_v44 = vsel %vm260_vm0, %v697_v36, 0  ;;  %v3256_v45 = vsel %vm260_vm0, %v698_v38, 0  ;;  %v3259_v46 = vsel %vm260_vm0, %v786_v40, 0  ;;  %v3320_v33 = vpop.f32.mrf.mxu3 }
  0xd5   : > { %3735 = vst [vmem:[#allocation12_spill] sm:$0xff] %v3256_v45  ;;  %v3262_v48 = vsel %vm260_vm0, %v787_v43, 0  ;;  %736 = vmatpush.bf16.msrb.mxu1 %v3256_v45  ;;  %723 = vmatpush.bf16.msrb.mxu0 %v705_v44 }
  0xd6   : > { %3736 = vst [vmem:[#allocation13_spill] sm:$0xff] %v3259_v46  ;;  %837 = vmatpush.bf16.msra.mxu2 %v3262_v48 }
  0xd7   : > { %3737 = vst [vmem:[#allocation14_spill] sm:$0xff] %v3262_v48 }
  0xd8   : > { %1480 = vrot.lane.b32.xlu0 %v2969_v8, %s2874_s11  ;;  %1570 = vrot.lane.b32.xlu1 %v2967_v7, %s2875_s18 }
  0xd9   : > { %824 = vmatpush.bf16.msra.mxu1 %v3259_v46  ;;  %1572 = vrot.lane.b32.xlu2 %v2977_v11, %s2875_s18 }
  0xda   : > { %v3273_v49 = vpop.permute.xlu0 %782  ;;  %v775_v50 = vpop.permute.xlu1 %774 }
  0xdb   : > { %3738 = vst [vmem:[#allocation15_spill] sm:$0xff] %v3273_v49  ;;  %v788_v54 = vsel %vm784_vm7, %v3188_v1, %v3273_v49  ;;  %v785_v56 = vsel %vm784_vm7, %v775_v50, %v777_v22  ;;  %v951_v63 = vpop.permute.xlu2 %950  ;;  %v284_v50 = vpop.f32.mrf.mxu0 }
  0xdc   : > { %v3280_v57 = vsel %vm260_vm0, %v788_v54, 0  ;;  %v793_v58 = vsel %vm260_vm0, %v785_v56, 0  ;;  %v297_v54 = vpop.f32.mrf.mxu1  ;;  %v2878_v56 = vmov 0  }
  0xdd   : > { %3739 = vst [vmem:[#allocation16_spill] sm:$0xff] %v3280_v57  ;;  %850 = vmatpush.bf16.msra.mxu3 %v3280_v57  ;;  %811 = vmatpush.bf16.msra.mxu0 %v793_v58  ;;  %v310_v58 = vpop.f32.mrf.mxu2 }
  0xde   : > { %2780 = vset.pattern.permute.xlu0 %v2878_v56 }
  0xe0   : > { %1574 = vrot.lane.b32.xlu0 %v2965_v6, %s2875_s18  ;;  %1566 = vrot.lane.b32.xlu1 %v2979_v12, %s2875_s18 }
  0xe1   : > { %1568 = vrot.lane.b32.xlu2 %v2969_v8, %s2875_s18 }
  0xe2   : > { %2590 = vmatmul.msk.bf16.vlgmr.msrb.gmra.mxu0 %vm256_vm1, %v2589_v59  ;;  %2591 = vmatmul.msk.bf16.vlgmr.msrb.gmra.mxu1 %vm256_vm1, %v2589_v59  ;;  %v867_v61 = vpop.permute.xlu0 %866  ;;  %v869_v62 = vpop.permute.xlu1 %868 }
  0xe3   : > { %2592 = vmatmul.msk.bf16.vlgmr.msrb.gmra.mxu2 %vm256_vm1, %v2589_v59  ;;  %2593 = vmatmul.msk.bf16.vlgmr.msrb.gmra.mxu3 %vm256_vm1, %v2589_v59  ;;  %v875_v1 = vsel %vm872_vm8, %v867_v61, %v869_v62  ;;  %v876_v2 = vsel %vm872_vm8, %v869_v62, %v3235_v31  ;;  %v1045_v27 = vpop.permute.xlu2 %1044  ;;  %v323_v59 = vpop.f32.mrf.mxu3  ;;  %v1894_v62 = vunpack.c.h.b16 %v2962_v0 }
  0xe4   : > { %v3296_v3 = vsel %vm260_vm0, %v875_v1, 0  ;;  %v3299_v9 = vsel %vm260_vm0, %v876_v2, 0 }
  0xe5   : > { %3740 = vst [vmem:[#allocation17_spill] sm:$0xff] %v3296_v3  ;;  %925 = vmatpush.bf16.msrb.mxu2 %v3296_v3  ;;  %938 = vmatpush.bf16.msrb.mxu3 %v3299_v9 }
  0xe6   : > { %3741 = vst [vmem:[#allocation18_spill] sm:$0xff] %v3299_v9 }
  0xe8   : > { %1658 = vrot.lane.b32.xlu0 %v2967_v7, %s2876_s27  ;;  %1660 = vrot.lane.b32.xlu1 %v2977_v11, %s2876_s27 }
  0xe9   : > { %1662 = vrot.lane.b32.xlu2 %v2965_v6, %s2876_s27 }
  0xea   : > { %v863_v10 = vpop.permute.xlu0 %862  ;;  %v865_v15 = vpop.permute.xlu1 %864 }
  0xeb   : > { %v873_v16 = vsel %vm872_vm8, %v863_v10, %v865_v15  ;;  %v874_v18 = vsel %vm872_vm8, %v865_v15, %v867_v61  ;;  %v1041_v61 = vpop.permute.xlu2 %1040 }
  0xec   : > { %v881_v19 = vsel %vm260_vm0, %v873_v16, 0  ;;  %v3310_v22 = vsel %vm260_vm0, %v874_v18, 0  ;;  %v1895_v18 = vpack.c.b16 %v1894_v62, %v1894_v62  ;;  %v2604_v62 = vld [vmem:[%s3033_s19 + $0x20] sm:$0xf] }
  0xed   : > { %3742 = vst [vmem:[#allocation19_spill] sm:$0xff] %v3310_v22  ;;  %912 = vmatpush.bf16.msrb.mxu1 %v3310_v22  ;;  %899 = vmatpush.bf16.msrb.mxu0 %v881_v19 }
  0xf0   : > { %1654 = vrot.lane.b32.xlu0 %v2979_v12, %s2876_s27  ;;  %1656 = vrot.lane.b32.xlu1 %v2969_v8, %s2876_s27 }
  0xf1   : > { %1746 = vrot.lane.b32.xlu2 %v2967_v7, %s2877_s28 }
  0xf2   : > { %2595 = vmatmul.msk.bf16.vlgmr.msra.gmra.mxu0 %vm256_vm1, %v2594_v30  ;;  %2596 = vmatmul.msk.bf16.vlgmr.msra.gmra.mxu1 %vm256_vm1, %v2594_v30  ;;  %v957_v36 = vpop.permute.xlu0 %956  ;;  %v3329_v38 = vpop.permute.xlu1 %958 }
  0xf3   : > { %2597 = vmatmul.msk.bf16.vlgmr.msra.gmra.mxu2 %vm256_vm1, %v2594_v30  ;;  %3743 = vst [vmem:[#allocation20_spill] sm:$0xff] %v3329_v38  ;;  %2598 = vmatmul.msk.bf16.vlgmr.msra.gmra.mxu3 %vm256_vm1, %v2594_v30  ;;  %v963_v40 = vsel %vm960_vm9, %v3270_v47, %v957_v36  ;;  %v964_v43 = vsel %vm960_vm9, %v957_v36, %v3329_v38 }
  0xf4   : > { %v3337_v44 = vsel %vm260_vm0, %v963_v40, 0  ;;  %v3340_v7 = vsel %vm260_vm0, %v964_v43, 0 }
  0xf5   : > { %3744 = vst [vmem:[#allocation21_spill] sm:$0xff] %v3337_v44  ;;  %1013 = vmatpush.bf16.msra.mxu2 %v3337_v44  ;;  %1026 = vmatpush.bf16.msra.mxu3 %v3340_v7 }
  0xf6   : > { %3745 = vst [vmem:[#allocation22_spill] sm:$0xff] %v3340_v7 }
  0xf8   : > { %1748 = vrot.lane.b32.xlu0 %v2977_v11, %s2877_s28  ;;  %1750 = vrot.lane.b32.xlu1 %v2965_v6, %s2877_s28 }
  0xf9   : > { %1742 = vrot.lane.b32.xlu2 %v2979_v12, %s2877_s28  ;;  %v2599_v12 = vld [vmem:[%s3033_s19 + $0x1c] sm:$0xf] }
  0xfa   : > { %v953_v1 = vpop.permute.xlu0 %952  ;;  %v1043_v2 = vpop.permute.xlu1 %1042 }
  0xfb   : > { %v961_v10 = vsel %vm960_vm9, %v951_v63, %v953_v1  ;;  %v962_v15 = vsel %vm960_vm9, %v953_v1, %v3270_v47  ;;  %v1050_v19 = vsel %vm1048_vm10, %v1041_v61, %v1043_v2  ;;  %v1051_v0 = vsel %vm1048_vm10, %v1043_v2, %v1045_v27  ;;  %v1135_v47 = vpop.permute.xlu2 %1134 }
  0xfc   : > { %v969_v16 = vsel %vm260_vm0, %v961_v10, 0  ;;  %v3356_v11 = vsel %vm260_vm0, %v962_v15, 0  ;;  %v1060_v30 = vsel %vm260_vm0, %v1050_v19, 0  ;;  %v1063_v63 = vsel %vm260_vm0, %v1051_v0, 0 }
  0xfd   : > { %3746 = vst [vmem:[#allocation23_spill] sm:$0xff] %v3356_v11  ;;  %1000 = vmatpush.bf16.msra.mxu1 %v3356_v11  ;;  %987 = vmatpush.bf16.msra.mxu0 %v969_v16 }
 0x100   : > { %1744 = vrot.lane.b32.xlu0 %v2969_v8, %s2877_s28  ;;  %1896 = vrot.lane.b32.xlu1 %v1895_v18, %s2861_s4  ;;  %s2563_s4 = sshll.u32 %s2956_s26, 3 }
 0x101   : > { %1963 = vrot.lane.b32.xlu2 %v1895_v18, %s2862_s5 }
 0x102   : > { %2600 = vmatmul.msk.bf16.vlgmr.msrb.gmra.mxu0 %vm256_vm1, %v2599_v12  ;;  %2601 = vmatmul.msk.bf16.vlgmr.msrb.gmra.mxu1 %vm256_vm1, %v2599_v12  ;;  %v1047_v36 = vpop.permute.xlu0 %1046  ;;  %v1039_v40 = vpop.permute.xlu1 %1038 }
 0x103   : > { %2602 = vmatmul.msk.bf16.vlgmr.msrb.gmra.mxu2 %vm256_vm1, %v2599_v12  ;;  %2603 = vmatmul.msk.bf16.vlgmr.msrb.gmra.mxu3 %vm256_vm1, %v2599_v12  ;;  %v1052_v43 = vsel %vm1048_vm10, %v1045_v27, %v1047_v36  ;;  %v1049_v8 = vsel %vm1048_vm10, %v1039_v40, %v1041_v61  ;;  %v1219_v58 = vpop.permute.xlu2 %1218  ;;  %vm1576_vm10 = vcmask 392192  }
 0x104   : > { %1088 = vmatpush.bf16.msrb.mxu1 %v1060_v30  ;;  %v1066_v50 = vsel %vm260_vm0, %v1052_v43, 0  ;;  %v1057_v54 = vsel %vm260_vm0, %v1049_v8, 0  ;;  %1101 = vmatpush.bf16.msrb.mxu2 %v1063_v63 }
 0x105   : > { %1114 = vmatpush.bf16.msrb.mxu3 %v1066_v50  ;;  %1075 = vmatpush.bf16.msrb.mxu0 %v1057_v54  ;;  %v2609_v50 = vld [vmem:[%s3033_s19 + $0x24] sm:$0xf] }
 0x108   : > { %2030 = vrot.lane.b32.xlu0 %v1895_v18, %s2863_s6  ;;  %2097 = vrot.lane.b32.xlu1 %v1895_v18, %s2864_s7  ;;  %s224_s6 = scalar_lea.vmem %s3704_s1, %s2563_s4  ;;  %s213_s7 = sand.u32 1, %s2843_s13  }
 0x109   : > { %2164 = vrot.lane.b32.xlu2 %v1895_v18, %s2865_s8  ;;  %v239_v30 = vld [vmem:[%s224_s6] sm:$0xff]  ;;  %s2561_s8 = sshll.u32 %s213_s7, 5  ;;  %s2801_s4 = scalar_lea.hbm %s3706_s3, 64 }
 0x10a   : > { %v1131_v56 = vpop.permute.xlu0 %1130  ;;  %v1133_v27 = vpop.permute.xlu1 %1132 }
 0x10b   : > { %v1139_v59 = vsel %vm1136_vm11, %v1131_v56, %v1133_v27  ;;  %v1140_v61 = vsel %vm1136_vm11, %v1133_v27, %v1135_v47  ;;  %v1215_v12 = vpop.permute.xlu2 %1214 }
 0x10c   : > { %v1151_v1 = vsel %vm260_vm0, %v1139_v59, 0  ;;  %v1154_v2 = vsel %vm260_vm0, %v1140_v61, 0 }
 0x110   : > { %2231 = vrot.lane.b32.xlu0 %v1895_v18, %s2866_s9  ;;  %2298 = vrot.lane.b32.xlu1 %v1895_v18, %s2867_s21  ;;  %s2704_s9 = sshll.u32 %s2851_s15, 5  ;;  %s2435_s15 = scalar_lea.sflag [#allocation3], %s213_s7 }
 0x111   : > { %2365 = vrot.lane.b32.xlu2 %v1895_v18, %s2868_s23  ;;  %s2448_s29 = scalar_lea.hbm %s3706_s3, %s2704_s9 }
 0x112   : > { %2605 = vmatmul.msk.bf16.vlgmr.msra.gmra.mxu0 %vm256_vm1, %v2604_v62  ;;  %2606 = vmatmul.msk.bf16.vlgmr.msra.gmra.mxu1 %vm256_vm1, %v2604_v62  ;;  %v1127_v10 = vpop.permute.xlu0 %1126  ;;  %v1129_v15 = vpop.permute.xlu1 %1128  ;;  %s2452_s10 = sshll.u32 %s2448_s29, 4  ;;  %s2453_s10 = int_to_ptr.hbm [resolvable:$true] %s2452_s10 }
 0x113   : > { %2607 = vmatmul.msk.bf16.vlgmr.msra.gmra.mxu2 %vm256_vm1, %v2604_v62  ;;  %2608 = vmatmul.msk.bf16.vlgmr.msra.gmra.mxu3 %vm256_vm1, %v2604_v62  ;;  %v1137_v16 = vsel %vm1136_vm11, %v1127_v10, %v1129_v15  ;;  %v1138_v19 = vsel %vm1136_vm11, %v1129_v15, %v1131_v56  ;;  %v1309_v56 = vpop.permute.xlu2 %1308  ;;  %vm1664_vm11 = vcmask 384000   ;;  %s2795_s11 = sshra.s32 %s2453_s10, 4  ;;  %s2796_s11 = int_to_ptr.hbm [resolvable:$true] %s2795_s11 }
 0x114   : > { %1189 = vmatpush.bf16.msra.mxu2 %v1151_v1  ;;  %v1145_v18 = vsel %vm260_vm0, %v1137_v16, 0  ;;  %v1148_v0 = vsel %vm260_vm0, %v1138_v19, 0  ;;  %1202 = vmatpush.bf16.msra.mxu3 %v1154_v2  ;;  %s2797_s18 = scalar_lea.hbm %s2796_s11, 32  ;;  %p2802_p1 = scmp.lt.s32.totalorder %s2796_s11, %s3706_s3 }
 0x115   : > { %1176 = vmatpush.bf16.msra.mxu1 %v1148_v0  ;;  %1163 = vmatpush.bf16.msra.mxu0 %v1145_v18  ;;  %p2798_p12 = scmp.ne.s32.totalorder %s2796_s11, %s2797_s18  ;;  %p2803_p2 = scmp.lt.s32.totalorder %s2801_s4, %s2797_s18 }
 0x116   : > { %v3399_v47 = vpop.f32.mrf.mxu1 }
 0x117   : > { %p2799_p13 = pnand %p2798_p12, %p2939_p4  ;;  %p2804_p3 = por %p2803_p2, %p2802_p1 }
 0x118   : > { %242 = vperm.xlu0 %2780, %v239_v30  }
 0x119   : > { %p2800_p0 = pneg %p2799_p13 }
 0x11a   : > { %v1221_v63 = vpop.permute.xlu0 %1220  ;;  %v1223_v36 = vpop.permute.xlu1 %1222 }
 0x11b   : > { %v1227_v40 = vsel %vm1224_vm12, %v1219_v58, %v1221_v63  ;;  %v1228_v43 = vsel %vm1224_vm12, %v1221_v63, %v1223_v36  ;;  %v1305_v0 = vpop.permute.xlu2 %1304  ;;  %p2805_p5 = pnand %p2804_p3, %p2800_p0 }
 0x11c   : > { %v1239_v27 = vsel %vm260_vm0, %v1227_v40, 0  ;;  %v1242_v59 = vsel %vm260_vm0, %v1228_v43, 0 }
 0x11e   : > { %v3403_v8 = vpop.f32.mrf.mxu0  ;;  %v388_v54 = vpop.f32.mrf.mxu1 }
 0x11f   : > { %v2614_v54 = vld [vmem:[%s3033_s19 + $0x28] sm:$0xf] }
 0x122   : > { %2610 = vmatmul.msk.bf16.vlgmr.msrb.gmra.mxu0 %vm256_vm1, %v2609_v50  ;;  %2611 = vmatmul.msk.bf16.vlgmr.msrb.gmra.mxu1 %vm256_vm1, %v2609_v50  ;;  %v1217_v61 = vpop.permute.xlu0 %1216  ;;  %v1307_v62 = vpop.permute.xlu1 %1306 }
 0x123   : > { %2612 = vmatmul.msk.bf16.vlgmr.msrb.gmra.mxu2 %vm256_vm1, %v2609_v50  ;;  %2613 = vmatmul.msk.bf16.vlgmr.msrb.gmra.mxu3 %vm256_vm1, %v2609_v50  ;;  %v1225_v1 = vsel %vm1224_vm12, %v1215_v12, %v1217_v61  ;;  %v1226_v2 = vsel %vm1224_vm12, %v1217_v61, %v1219_v58  ;;  %v1314_v63 = vsel %vm1312_vm13, %v1305_v0, %v1307_v62  ;;  %vm1752_vm12 = vcmask 375808  }
 0x124   : > { %v1233_v10 = vsel %vm260_vm0, %v1225_v1, 0  ;;  %v1236_v15 = vsel %vm260_vm0, %v1226_v2, 0  ;;  %1277 = vmatpush.bf16.msrb.mxu2 %v1239_v27  ;;  %1290 = vmatpush.bf16.msrb.mxu3 %v1242_v59  ;;  %v1315_v40 = vsel %vm1312_vm13, %v1307_v62, %v1309_v56  ;;  %v1324_v61 = vsel %vm260_vm0, %v1314_v63, 0 }
 0x125   : > { %v3416_v16 = vpop.f32.mrf.mxu2  ;;  %v3418_v19 = vpop.f32.mrf.mxu3  ;;  %1264 = vmatpush.bf16.msrb.mxu1 %v1236_v15  ;;  %1251 = vmatpush.bf16.msrb.mxu0 %v1233_v10  ;;  %v1327_v1 = vsel %vm260_vm0, %v1315_v40, 0 }
 0x126   : > { %v375_v18 = vpop.f32.mrf.mxu0  ;;  %v1399_v15 = vpop.permute.xlu2 %1398 }
 0x12a   : > { %v1311_v30 = vpop.permute.xlu0 %1310  ;;  %v1303_v12 = vpop.permute.xlu1 %1302 }
 0x12b   : > { %v1316_v43 = vsel %vm1312_vm13, %v1309_v56, %v1311_v30  ;;  %v1313_v27 = vsel %vm1312_vm13, %v1303_v12, %v1305_v0 }
 0x12c   : > { %v1330_v2 = vsel %vm260_vm0, %v1316_v43, 0  ;;  %v1321_v10 = vsel %vm260_vm0, %v1313_v27, 0 }
 0x12d   : > { %v401_v58 = vpop.f32.mrf.mxu2  ;;  %v414_v36 = vpop.f32.mrf.mxu3 }
 0x12e   : > { %v1483_v36 = vpop.permute.xlu2 %1482 }
 0x12f   : > { %v3420_v50 = vpop.f32.mrf.mxu0  ;;  %v3423_v59 = vpop.f32.mrf.mxu1 }
 0x132   : > { %2615 = vmatmul.msk.bf16.vlgmr.msra.gmra.mxu0 %vm256_vm1, %v2614_v54  ;;  %2616 = vmatmul.msk.bf16.vlgmr.msra.gmra.mxu1 %vm256_vm1, %v2614_v54  ;;  %v1395_v56 = vpop.permute.xlu0 %1394  ;;  %v1397_v62 = vpop.permute.xlu1 %1396 }
 0x133   : > { %2617 = vmatmul.msk.bf16.vlgmr.msra.gmra.mxu2 %vm256_vm1, %v2614_v54  ;;  %2618 = vmatmul.msk.bf16.vlgmr.msra.gmra.mxu3 %vm256_vm1, %v2614_v54  ;;  %v1403_v27 = vsel %vm1400_vm14, %v1395_v56, %v1397_v62  ;;  %v1404_v7 = vsel %vm1400_vm14, %v1397_v62, %v1399_v15 }
 0x134   : > { %1352 = vmatpush.bf16.msra.mxu1 %v1324_v61  ;;  %1365 = vmatpush.bf16.msra.mxu2 %v1327_v1  ;;  %v2619_v1 = vld [vmem:[%s3033_s19 + $0x2c] sm:$0xf] }
 0x135   : > { %1378 = vmatpush.bf16.msra.mxu3 %v1330_v2  ;;  %1339 = vmatpush.bf16.msra.mxu0 %v1321_v10 }
 0x136   : > { %v3433_v18 = vpop.f32.mrf.mxu2  ;;  %v3435_v0 = vpop.f32.mrf.mxu3 }
 0x137   : > { %v463_v30 = vpop.f32.mrf.mxu0  ;;  %v476_v12 = vpop.f32.mrf.mxu1 }
 0x138   : > { %v1415_v30 = vsel %vm260_vm0, %v1403_v27, 0  ;;  %v1418_v12 = vsel %vm260_vm0, %v1404_v7, 0 }
 0x13a   : > { %v1391_v63 = vpop.permute.xlu0 %1390  ;;  %v1393_v58 = vpop.permute.xlu1 %1392 }
 0x13b   : > { %v1402_v40 = vsel %vm1400_vm14, %v1393_v58, %v1395_v56  ;;  %v1401_v2 = vsel %vm1400_vm14, %v1391_v63, %v1393_v58 }
 0x13c   : > { %v1412_v10 = vsel %vm260_vm0, %v1402_v40, 0  ;;  %v1409_v11 = vsel %vm260_vm0, %v1401_v2, 0  ;;  %v1479_v40 = vpop.permute.xlu2 %1478 }
 0x13e   : > { %v489_v43 = vpop.f32.mrf.mxu2  ;;  %v502_v54 = vpop.f32.mrf.mxu3 }
 0x13f   : > { %v3437_v61 = vpop.f32.mrf.mxu0  ;;  %v3440_v44 = vpop.f32.mrf.mxu1 }
 0x142   : > { %2620 = vmatmul.msk.bf16.vlgmr.msrb.gmra.mxu0 %vm256_vm1, %v2619_v1  ;;  %2621 = vmatmul.msk.bf16.vlgmr.msrb.gmra.mxu1 %vm256_vm1, %v2619_v1  ;;  %v1485_v56 = vpop.permute.xlu0 %1484  ;;  %v1487_v62 = vpop.permute.xlu1 %1486 }
 0x143   : > { %2622 = vmatmul.msk.bf16.vlgmr.msrb.gmra.mxu2 %vm256_vm1, %v2619_v1  ;;  %2623 = vmatmul.msk.bf16.vlgmr.msrb.gmra.mxu3 %vm256_vm1, %v2619_v1  ;;  %v1491_v38 = vsel %vm1488_vm15, %v1483_v36, %v1485_v56  ;;  %v1492_v1 = vsel %vm1488_vm15, %v1485_v56, %v1487_v62 }
 0x144   : > { %1440 = vmatpush.bf16.msrb.mxu1 %v1412_v10  ;;  %1453 = vmatpush.bf16.msrb.mxu2 %v1415_v30  ;;  %v2624_v30 = vld [vmem:[%s3033_s19 + $0x30] sm:$0xf]  ;;  %v1573_v22 = vpop.permute.xlu2 %1572 }
 0x145   : > { %1466 = vmatpush.bf16.msrb.mxu3 %v1418_v12  ;;  %1427 = vmatpush.bf16.msrb.mxu0 %v1409_v11 }
 0x146   : > { %v3450_v15 = vpop.f32.mrf.mxu2  ;;  %v3452_v7 = vpop.f32.mrf.mxu3 }
 0x147   : > { %v551_v63 = vpop.f32.mrf.mxu0  ;;  %v564_v58 = vpop.f32.mrf.mxu1 }
 0x148   : > { %v1503_v63 = vsel %vm260_vm0, %v1491_v38, 0  ;;  %v1506_v58 = vsel %vm260_vm0, %v1492_v1, 0 }
 0x14a   : > { %v1481_v43 = vpop.permute.xlu0 %1480  ;;  %v1571_v54 = vpop.permute.xlu1 %1570 }
 0x14b   : > { %v1490_v27 = vsel %vm1488_vm15, %v1481_v43, %v1483_v36  ;;  %v1489_v12 = vsel %vm1488_vm15, %v1479_v40, %v1481_v43  ;;  %v1579_v31 = vsel %vm1576_vm10, %v1571_v54, %v1573_v22 }
 0x14c   : > { %v1500_v11 = vsel %vm260_vm0, %v1490_v27, 0  ;;  %v1569_v27 = vpop.permute.xlu2 %1568 }
 0x14d   : > { %v1578_v1 = vsel %vm1576_vm10, %v1569_v27, %v1571_v54 }
 0x14e   : > { %v577_v2 = vpop.f32.mrf.mxu2  ;;  %v590_v9 = vpop.f32.mrf.mxu3 }
 0x14f   : > { %v3454_v10 = vpop.f32.mrf.mxu0  ;;  %v3457_v3 = vpop.f32.mrf.mxu1  ;;  %v1497_v2 = vsel %vm260_vm0, %v1489_v12, 0 }
 0x152   : > { %2625 = vmatmul.msk.bf16.vlgmr.msra.gmra.mxu0 %vm256_vm1, %v2624_v30  ;;  %2626 = vmatmul.msk.bf16.vlgmr.msra.gmra.mxu1 %vm256_vm1, %v2624_v30  ;;  %v1575_v9 = vpop.permute.xlu0 %1574  ;;  %v1567_v40 = vpop.permute.xlu1 %1566 }
 0x153   : > { %2627 = vmatmul.msk.bf16.vlgmr.msra.gmra.mxu2 %vm256_vm1, %v2624_v30  ;;  %2628 = vmatmul.msk.bf16.vlgmr.msra.gmra.mxu3 %vm256_vm1, %v2624_v30  ;;  %v1580_v57 = vsel %vm1576_vm10, %v1573_v22, %v1575_v9 }
 0x154   : > { %1528 = vmatpush.bf16.msra.mxu1 %v1500_v11  ;;  %1541 = vmatpush.bf16.msra.mxu2 %v1503_v63  ;;  %v2629_v63 = vld [vmem:[%s3033_s19 + $0x34] sm:$0xf] }
 0x155   : > { %1554 = vmatpush.bf16.msra.mxu3 %v1506_v58  ;;  %1515 = vmatpush.bf16.msra.mxu0 %v1497_v2  ;;  %v1577_v58 = vsel %vm1576_vm10, %v1567_v40, %v1569_v27  ;;  %v1588_v2 = vsel %vm260_vm0, %v1578_v1, 0  ;;  %v1663_v40 = vpop.permute.xlu2 %1662 }
 0x156   : > { %v3467_v36 = vpop.f32.mrf.mxu2  ;;  %v3469_v38 = vpop.f32.mrf.mxu3  ;;  %v1585_v46 = vsel %vm260_vm0, %v1577_v58, 0 }
 0x157   : > { %v639_v56 = vpop.f32.mrf.mxu0  ;;  %v652_v62 = vpop.f32.mrf.mxu1 }
 0x158   : > { %v1591_v56 = vsel %vm260_vm0, %v1579_v31, 0  ;;  %v1594_v62 = vsel %vm260_vm0, %v1580_v57, 0 }
 0x15a   : > { %v1659_v43 = vpop.permute.xlu0 %1658 }
 0x15d   : > { %v1747_v45 = vpop.permute.xlu2 %1746 }
 0x15e   : > { %v665_v12 = vpop.f32.mrf.mxu2  ;;  %v678_v30 = vpop.f32.mrf.mxu3 }
 0x15f   : > { %v3471_v11 = vpop.f32.mrf.mxu0  ;;  %v3474_v48 = vpop.f32.mrf.mxu1 }
 0x160   : > { %v1661_v12 = vpop.permute.xlu1 %1660 }
 0x161   : > { %v1667_v49 = vsel %vm1664_vm11, %v1659_v43, %v1661_v12  ;;  %v1668_v29 = vsel %vm1664_vm11, %v1661_v12, %v1663_v40 }
 0x162   : > { %2630 = vmatmul.msk.bf16.vlgmr.msrb.gmra.mxu0 %vm256_vm1, %v2629_v63  ;;  %2631 = vmatmul.msk.bf16.vlgmr.msrb.gmra.mxu1 %vm256_vm1, %v2629_v63  ;;  %v1655_v22 = vpop.permute.xlu0 %1654 }
 0x163   : > { %2632 = vmatmul.msk.bf16.vlgmr.msrb.gmra.mxu2 %vm256_vm1, %v2629_v63  ;;  %2633 = vmatmul.msk.bf16.vlgmr.msrb.gmra.mxu3 %vm256_vm1, %v2629_v63 }
 0x164   : > { %1616 = vmatpush.bf16.msrb.mxu1 %v1588_v2  ;;  %1629 = vmatpush.bf16.msrb.mxu2 %v1591_v56  ;;  %v2634_v56 = vld [vmem:[%s3033_s19 + $0x38] sm:$0xf] }
 0x165   : > { %1642 = vmatpush.bf16.msrb.mxu3 %v1594_v62  ;;  %1603 = vmatpush.bf16.msrb.mxu0 %v1585_v46 }
 0x166   : > { %v3484_v54 = vpop.f32.mrf.mxu2  ;;  %v3486_v31 = vpop.f32.mrf.mxu3 }
 0x167   : > { %v727_v57 = vpop.f32.mrf.mxu0  ;;  %v740_v9 = vpop.f32.mrf.mxu1 }
 0x168   : > { %v1657_v1 = vpop.permute.xlu1 %1656  ;;  %v1679_v57 = vsel %vm260_vm0, %v1667_v49, 0  ;;  %v1682_v9 = vsel %vm260_vm0, %v1668_v29, 0 }
 0x169   : > { %v1666_v30 = vsel %vm1664_vm11, %v1657_v1, %v1659_v43  ;;  %v1665_v62 = vsel %vm1664_vm11, %v1655_v22, %v1657_v1  ;;  %v1743_v1 = vpop.permute.xlu2 %1742 }
 0x16a   : > { %v1749_v27 = vpop.permute.xlu0 %1748  ;;  %v1676_v46 = vsel %vm260_vm0, %v1666_v30, 0 }
 0x16b   : > { %v1755_v24 = vsel %vm1752_vm12, %v1747_v45, %v1749_v27 }
 0x16e   : > { %v753_v58 = vpop.f32.mrf.mxu2  ;;  %v766_v63 = vpop.f32.mrf.mxu3 }
 0x16f   : > { %v3488_v2 = vpop.f32.mrf.mxu0  ;;  %v3491_v28 = vpop.f32.mrf.mxu1  ;;  %v1673_v58 = vsel %vm260_vm0, %v1665_v62, 0 }
 0x170   : > { %v1751_v30 = vpop.permute.xlu1 %1750 }
 0x172   : > { %2635 = vmatmul.msk.bf16.vlgmr.msra.gmra.mxu0 %vm256_vm1, %v2634_v56  ;;  %2636 = vmatmul.msk.bf16.vlgmr.msra.gmra.mxu1 %vm256_vm1, %v2634_v56  ;;  %v1745_v43 = vpop.permute.xlu0 %1744 }
 0x173   : > { %2637 = vmatmul.msk.bf16.vlgmr.msra.gmra.mxu2 %vm256_vm1, %v2634_v56  ;;  %2638 = vmatmul.msk.bf16.vlgmr.msra.gmra.mxu3 %vm256_vm1, %v2634_v56  ;;  %v1754_v63 = vsel %vm1752_vm12, %v1745_v43, %v1747_v45  ;;  %v1756_v56 = vsel %vm1752_vm12, %v1749_v27, %v1751_v30  ;;  %v1753_v5 = vsel %vm1752_vm12, %v1743_v1, %v1745_v43 }
 0x174   : > { %1704 = vmatpush.bf16.msra.mxu1 %v1676_v46  ;;  %1717 = vmatpush.bf16.msra.mxu2 %v1679_v57  ;;  %v1761_v20 = vsel %vm260_vm0, %v1753_v5, 0 }
 0x175   : > { %1730 = vmatpush.bf16.msra.mxu3 %v1682_v9  ;;  %1691 = vmatpush.bf16.msra.mxu0 %v1673_v58  ;;  %v2639_v9 = vld [vmem:[%s3033_s19 + $0x3c] sm:$0xf]  ;;  %v1764_v58 = vsel %vm260_vm0, %v1754_v63, 0 }
 0x176   : > { %v3501_v12 = vpop.f32.mrf.mxu2  ;;  %v3503_v29 = vpop.f32.mrf.mxu3 }
 0x177   : > { %v815_v49 = vpop.f32.mrf.mxu0  ;;  %v828_v22 = vpop.f32.mrf.mxu1 }
 0x178   : > { %v1767_v49 = vsel %vm260_vm0, %v1755_v24, 0  ;;  %v1770_v22 = vsel %vm260_vm0, %v1756_v56, 0 }
 0x17a   : > { %v3505_v40 = vpop.permute.xlu0 %2030 }
 0x17e   : > { %v841_v62 = vpop.f32.mrf.mxu2  ;;  %v854_v46 = vpop.f32.mrf.mxu3 }
 0x17f   : > { %v3507_v57 = vpop.f32.mrf.mxu0  ;;  %v3510_v4 = vpop.f32.mrf.mxu1 }
 0x182   : > { %2640 = vmatmul.msk.bf16.vlgmr.msrb.gmra.mxu0 %vm256_vm1, %v2639_v9  ;;  %2641 = vmatmul.msk.bf16.vlgmr.msrb.gmra.mxu1 %vm256_vm1, %v2639_v9  ;;  %v3519_v45 = vpop.permute.xlu0 %2231 }
 0x183   : > { %2642 = vmatmul.msk.bf16.vlgmr.msrb.gmra.mxu2 %vm256_vm1, %v2639_v9  ;;  %2643 = vmatmul.msk.bf16.vlgmr.msrb.gmra.mxu3 %vm256_vm1, %v2639_v9 }
 0x184   : > { %1792 = vmatpush.bf16.msrb.mxu1 %v1764_v58  ;;  %1805 = vmatpush.bf16.msrb.mxu2 %v1767_v49 }
 0x185   : > { %1818 = vmatpush.bf16.msrb.mxu3 %v1770_v22  ;;  %1779 = vmatpush.bf16.msrb.mxu0 %v1761_v20 }
 0x186   : > { %v927_v27 = vpop.f32.mrf.mxu2  ;;  %v940_v24 = vpop.f32.mrf.mxu3 }
 0x187   : > { %v903_v43 = vpop.f32.mrf.mxu0  ;;  %v916_v1 = vpop.f32.mrf.mxu1 }
 0x188   : > { %v2644_v1 = vld [vmem:[%s3033_s19 + $0x40] sm:$0xf] }
 0x18a   : > { %v243_v30 = vpop.permute.xlu0 %242 }
 0x18b   : > { %v325_v5 = vadd.f32 %v3312_v23, %v243_v30  ;;  %v326_v63 = vadd.f32 %v3314_v26, %v243_v30  ;;  %v327_v62 = vadd.f32 %v3318_v32, %v243_v30  ;;  %v328_v56 = vadd.f32 %v3320_v33, %v243_v30 }
 0x18d   : > { %v416_v46 = vadd.f32 %v3403_v8, %v325_v5  ;;  %v417_v9 = vadd.f32 %v3399_v47, %v326_v63  ;;  %v418_v58 = vadd.f32 %v3416_v16, %v327_v62  ;;  %v419_v20 = vadd.f32 %v3418_v19, %v328_v56 }
 0x18e   : > { %v929_v49 = vpop.f32.mrf.mxu2  ;;  %v942_v22 = vpop.f32.mrf.mxu3 }
 0x18f   : > { %v989_v43 = vpop.f32.mrf.mxu0  ;;  %v504_v23 = vadd.f32 %v3420_v50, %v416_v46  ;;  %v505_v26 = vadd.f32 %v3423_v59, %v417_v9  ;;  %v506_v32 = vadd.f32 %v3433_v18, %v418_v58  ;;  %v507_v33 = vadd.f32 %v3435_v0, %v419_v20  ;;  %v1002_v30 = vpop.f32.mrf.mxu1  ;;  %v2649_v20 = vld [vmem:[%s3033_s19 + $0x44] sm:$0xf] }
 0x190   : > { %v1834_v50 = vsel %vm260_vm0, %v2965_v6, 0  ;;  %v1897_v9 = vpop.permute.xlu1 %1896 }
 0x191   : > { %v592_v8 = vadd.f32 %v3437_v61, %v504_v23  ;;  %v593_v47 = vadd.f32 %v3440_v44, %v505_v26  ;;  %v594_v16 = vadd.f32 %v3450_v15, %v506_v32  ;;  %v595_v19 = vadd.f32 %v3452_v7, %v507_v33  ;;  %v1964_v23 = vpop.permute.xlu2 %1963 }
 0x192   : > { %2645 = vmatmul.msk.bf16.vlgmr.msra.gmra.mxu0 %vm256_vm1, %v2644_v1  ;;  %2646 = vmatmul.msk.bf16.vlgmr.msra.gmra.mxu1 %vm256_vm1, %v2644_v1 }
 0x193   : > { %2647 = vmatmul.msk.bf16.vlgmr.msra.gmra.mxu2 %vm256_vm1, %v2644_v1  ;;  %v680_v59 = vadd.f32 %v3454_v10, %v592_v8  ;;  %v681_v18 = vadd.f32 %v3457_v3, %v593_v47  ;;  %2648 = vmatmul.msk.bf16.vlgmr.msra.gmra.mxu3 %vm256_vm1, %v2644_v1  ;;  %v682_v44 = vadd.f32 %v3467_v36, %v594_v16 }
 0x194   : > { %v683_v0 = vadd.f32 %v3469_v38, %v595_v19  ;;  %1843 = vmatpush.bf16.msra.mxu0 %v3058_v17  ;;  %1856 = vmatpush.bf16.msra.mxu1 %v3037_v13 }
 0x195   : > { %v768_v61 = vadd.f32 %v3471_v11, %v680_v59  ;;  %v769_v15 = vadd.f32 %v3474_v48, %v681_v18  ;;  %v770_v6 = vadd.f32 %v3484_v54, %v682_v44  ;;  %1869 = vmatpush.bf16.msra.mxu2 %v3041_v14  ;;  %1882 = vmatpush.bf16.msra.mxu3 %v1834_v50 }
 0x196   : > { %v1015_v7 = vpop.f32.mrf.mxu2  ;;  %v771_v10 = vadd.f32 %v3486_v31, %v683_v0  ;;  %v1028_v3 = vpop.f32.mrf.mxu3 }
 0x197   : > { %v991_v5 = vpop.f32.mrf.mxu0  ;;  %v856_v36 = vadd.f32 %v3488_v2, %v768_v61  ;;  %v857_v17 = vadd.f32 %v3491_v28, %v769_v15  ;;  %v858_v13 = vadd.f32 %v3501_v12, %v770_v6  ;;  %v1004_v48 = vpop.f32.mrf.mxu1  ;;  %v2659_v15 = vld [vmem:[%s3033_s19 + $0x4c] sm:$0xf] }
 0x198   : > { %v859_v38 = vadd.f32 %v3503_v29, %v771_v10  ;;  %v1898_v29 = vsel %vm344_vm2, %v3088_v21, %v1897_v9 }
 0x199   : > { %v944_v11 = vadd.f32 %v3507_v57, %v856_v36  ;;  %v945_v54 = vadd.f32 %v3510_v4, %v857_v17  ;;  %v946_v31 = vadd.f32 %v927_v27, %v858_v13  ;;  %v1903_v4 = vsel %vm260_vm0, %v1898_v29, 0  ;;  %v2098_v17 = vpop.permute.xlu1 %2097 }
 0x19a   : > { %v947_v63 = vadd.f32 %v940_v24, %v859_v38 }
 0x19b   : > { %v1032_v14 = vadd.f32 %v989_v43, %v944_v11  ;;  %v1033_v62 = vadd.f32 %v1002_v30, %v945_v54  ;;  %v1034_v56 = vadd.f32 %v1015_v7, %v946_v31  ;;  %v2654_v30 = vld [vmem:[%s3033_s19 + $0x48] sm:$0xf]  ;;  %v2664_v11 = vld [vmem:[%s3033_s19 + $0x50] sm:$0xf] }
 0x19c   : > { %v1035_v46 = vadd.f32 %v1028_v3, %v947_v63 }
 0x19e   : > { %v1017_v2 = vpop.f32.mrf.mxu2  ;;  %v1030_v58 = vpop.f32.mrf.mxu3 }
 0x19f   : > { %v1077_v28 = vpop.f32.mrf.mxu0  ;;  %v1090_v12 = vpop.f32.mrf.mxu1 }
 0x1a0   : > { %v1120_v49 = vadd.f32 %v1077_v28, %v1032_v14  ;;  %v1121_v22 = vadd.f32 %v1090_v12, %v1033_v62  ;;  %v3748_v14 = vld [vmem:[#allocation5_spill] sm:$0xff]  ;;  %v3749_v62 = vld [vmem:[#allocation6_spill] sm:$0xff]  ;;  %v2165_v28 = vpop.permute.xlu2 %2164 }
 0x1a2   : > { %2650 = vmatmul.msk.bf16.vlgmr.msrb.gmra.mxu0 %vm256_vm1, %v2649_v20  ;;  %2651 = vmatmul.msk.bf16.vlgmr.msrb.gmra.mxu1 %vm256_vm1, %v2649_v20 }
 0x1a3   : > { %2652 = vmatmul.msk.bf16.vlgmr.msrb.gmra.mxu2 %vm256_vm1, %v2649_v20  ;;  %2653 = vmatmul.msk.bf16.vlgmr.msrb.gmra.mxu3 %vm256_vm1, %v2649_v20 }
 0x1a4   : > { %1912 = vmatpush.bf16.msrb.mxu0 %v3094_v25  ;;  %1925 = vmatpush.bf16.msrb.mxu1 %v3108_v34  ;;  %v1965_v34 = vsel %vm432_vm3, %v3122_v37, %v1964_v23  ;;  %v3753_v23 = vld [vmem:[#allocation10_spill] sm:$0xff] }
 0x1a5   : > { %1938 = vmatpush.bf16.msrb.mxu2 %v3111_v35  ;;  %1951 = vmatpush.bf16.msrb.mxu3 %v1903_v4  ;;  %v1970_v35 = vsel %vm260_vm0, %v1965_v34, 0 }
 0x1a6   : > { %v1103_v57 = vpop.f32.mrf.mxu2  ;;  %v1116_v27 = vpop.f32.mrf.mxu3 }
 0x1a7   : > { %v1122_v21 = vadd.f32 %v1103_v57, %v1034_v56  ;;  %v1079_v24 = vpop.f32.mrf.mxu0  ;;  %v1123_v43 = vadd.f32 %v1116_v27, %v1035_v46  ;;  %v1092_v1 = vpop.f32.mrf.mxu1 }
 0x1a8   : > { %v3751_v24 = vld [vmem:[#allocation12_spill] sm:$0xff]  ;;  %v3752_v1 = vld [vmem:[#allocation9_spill] sm:$0xff] }
 0x1ae   : > { %v1105_v26 = vpop.f32.mrf.mxu2  ;;  %v1118_v32 = vpop.f32.mrf.mxu3 }
 0x1af   : > { %v1165_v33 = vpop.f32.mrf.mxu0  ;;  %v1178_v25 = vpop.f32.mrf.mxu1 }
 0x1b0   : > { %v1208_v8 = vadd.f32 %v1165_v33, %v1120_v49  ;;  %v1209_v47 = vadd.f32 %v1178_v25, %v1121_v22  ;;  %v2669_v22 = vld [vmem:[%s3033_s19 + $0x54] sm:$0xf] }
 0x1b2   : > { %2655 = vmatmul.msk.bf16.vlgmr.msra.gmra.mxu0 %vm256_vm1, %v2654_v30  ;;  %2656 = vmatmul.msk.bf16.vlgmr.msra.gmra.mxu1 %vm256_vm1, %v2654_v30 }
 0x1b3   : > { %2657 = vmatmul.msk.bf16.vlgmr.msra.gmra.mxu2 %vm256_vm1, %v2654_v30  ;;  %2658 = vmatmul.msk.bf16.vlgmr.msra.gmra.mxu3 %vm256_vm1, %v2654_v30 }
 0x1b4   : > { %1979 = vmatpush.bf16.msra.mxu0 %v3152_v51  ;;  %1992 = vmatpush.bf16.msra.mxu1 %v3130_v41  ;;  %v2032_v41 = vsel %vm520_vm4, %v3171_v55, %v3505_v40 }
 0x1b5   : > { %2005 = vmatpush.bf16.msra.mxu2 %v3133_v42  ;;  %2018 = vmatpush.bf16.msra.mxu3 %v1970_v35  ;;  %v2037_v42 = vsel %vm260_vm0, %v2032_v41, 0 }
 0x1b6   : > { %v1191_v16 = vpop.f32.mrf.mxu2  ;;  %v1204_v19 = vpop.f32.mrf.mxu3 }
 0x1b7   : > { %v1210_v37 = vadd.f32 %v1191_v16, %v1122_v21  ;;  %v1167_v50 = vpop.f32.mrf.mxu0  ;;  %v1211_v59 = vadd.f32 %v1204_v19, %v1123_v43  ;;  %v1180_v18 = vpop.f32.mrf.mxu1  ;;  %v3750_v21 = vld [vmem:[#allocation8_spill] sm:$0xff] }
 0x1b8   : > { %v2166_v27 = vsel %vm696_vm6, %v3750_v21, %v2165_v28  ;;  %v2674_v16 = vld [vmem:[%s3033_s19 + $0x58] sm:$0xf]  ;;  %v3765_v21 = vld [vmem:[#allocation22_spill] sm:$0xff] }
 0x1b9   : > { %v2171_v43 = vsel %vm260_vm0, %v2166_v27, 0 }
 0x1be   : > { %v1193_v44 = vpop.f32.mrf.mxu2  ;;  %v1206_v0 = vpop.f32.mrf.mxu3 }
 0x1bf   : > { %v1253_v61 = vpop.f32.mrf.mxu0  ;;  %v1266_v7 = vpop.f32.mrf.mxu1  ;;  %v3755_v44 = vld [vmem:[#allocation13_spill] sm:$0xff] }
 0x1c0   : > { %v1296_v6 = vadd.f32 %v1253_v61, %v1208_v8  ;;  %v1297_v51 = vadd.f32 %v1266_v7, %v1209_v47  ;;  %v3756_v61 = vld [vmem:[#allocation14_spill] sm:$0xff] }
 0x1c2   : > { %2660 = vmatmul.msk.bf16.vlgmr.msrb.gmra.mxu0 %vm256_vm1, %v2659_v15  ;;  %2661 = vmatmul.msk.bf16.vlgmr.msrb.gmra.mxu1 %vm256_vm1, %v2659_v15 }
 0x1c3   : > { %2662 = vmatmul.msk.bf16.vlgmr.msrb.gmra.mxu2 %vm256_vm1, %v2659_v15  ;;  %2663 = vmatmul.msk.bf16.vlgmr.msrb.gmra.mxu3 %vm256_vm1, %v2659_v15  ;;  %v3757_v15 = vld [vmem:[#allocation16_spill] sm:$0xff] }
 0x1c4   : > { %2046 = vmatpush.bf16.msrb.mxu0 %v3155_v52  ;;  %2059 = vmatpush.bf16.msrb.mxu1 %v3158_v53  ;;  %v2099_v53 = vsel %vm608_vm5, %v3125_v39, %v2098_v17 }
 0x1c5   : > { %2072 = vmatpush.bf16.msrb.mxu2 %v3181_v60  ;;  %2085 = vmatpush.bf16.msrb.mxu3 %v2037_v42  ;;  %v3747_v60 = vld [vmem:[#allocation7_spill] sm:$0xff]  ;;  %v2104_v63 = vsel %vm260_vm0, %v2099_v53, 0 }
 0x1c6   : > { %v1279_v10 = vpop.f32.mrf.mxu2  ;;  %v1292_v40 = vpop.f32.mrf.mxu3 }
 0x1c7   : > { %v1298_v55 = vadd.f32 %v1279_v10, %v1210_v37  ;;  %v1255_v3 = vpop.f32.mrf.mxu0  ;;  %v1299_v5 = vadd.f32 %v1292_v40, %v1211_v59  ;;  %v1268_v36 = vpop.f32.mrf.mxu1  ;;  %v3754_v59 = vld [vmem:[#allocation15_spill] sm:$0xff] }
 0x1c8   : > { %v2233_v18 = vsel %vm784_vm7, %v3754_v59, %v3519_v45  ;;  %v2299_v10 = vpop.permute.xlu1 %2298 }
 0x1c9   : > { %v2238_v0 = vsel %vm260_vm0, %v2233_v18, 0 }
 0x1ce   : > { %v1281_v13 = vpop.f32.mrf.mxu2  ;;  %v1294_v38 = vpop.f32.mrf.mxu3 }
 0x1cf   : > { %v1341_v48 = vpop.f32.mrf.mxu0  ;;  %v1354_v52 = vpop.f32.mrf.mxu1  ;;  %v3758_v38 = vld [vmem:[#allocation11_spill] sm:$0xff] }
 0x1d0   : > { %v1384_v54 = vadd.f32 %v1341_v48, %v1296_v6  ;;  %v1385_v31 = vadd.f32 %v1354_v52, %v1297_v51  ;;  %v2300_v48 = vsel %vm872_vm8, %v3758_v38, %v2299_v10  ;;  %v3760_v52 = vld [vmem:[#allocation17_spill] sm:$0xff] }
 0x1d2   : > { %2665 = vmatmul.msk.bf16.vlgmr.msra.gmra.mxu0 %vm256_vm1, %v2664_v11  ;;  %2666 = vmatmul.msk.bf16.vlgmr.msra.gmra.mxu1 %vm256_vm1, %v2664_v11 }
 0x1d3   : > { %2667 = vmatmul.msk.bf16.vlgmr.msra.gmra.mxu2 %vm256_vm1, %v2664_v11  ;;  %2668 = vmatmul.msk.bf16.vlgmr.msra.gmra.mxu3 %vm256_vm1, %v2664_v11  ;;  %v3759_v11 = vld [vmem:[#allocation19_spill] sm:$0xff] }
 0x1d4   : > { %2113 = vmatpush.bf16.msra.mxu0 %v3747_v60  ;;  %2126 = vmatpush.bf16.msra.mxu1 %v3748_v14 }
 0x1d5   : > { %2139 = vmatpush.bf16.msra.mxu2 %v3749_v62  ;;  %2152 = vmatpush.bf16.msra.mxu3 %v2104_v63 }
 0x1d6   : > { %v1367_v56 = vpop.f32.mrf.mxu2  ;;  %v1380_v46 = vpop.f32.mrf.mxu3 }
 0x1d7   : > { %v1386_v39 = vadd.f32 %v1367_v56, %v1298_v55  ;;  %v1343_v9 = vpop.f32.mrf.mxu0  ;;  %v1387_v2 = vadd.f32 %v1380_v46, %v1299_v5  ;;  %v1356_v58 = vpop.f32.mrf.mxu1  ;;  %v2679_v5 = vld [vmem:[%s3033_s19 + $0x5c] sm:$0xf] }
 0x1d8   : > { %v2684_v58 = vld [vmem:[%s3033_s19 + $0x60] sm:$0xf] }
 0x1de   : > { %v1369_v20 = vpop.f32.mrf.mxu2  ;;  %v1382_v49 = vpop.f32.mrf.mxu3 }
 0x1df   : > { %v1429_v12 = vpop.f32.mrf.mxu0  ;;  %v1442_v4 = vpop.f32.mrf.mxu1 }
 0x1e0   : > { %v1472_v29 = vadd.f32 %v1429_v12, %v1384_v54  ;;  %v1473_v57 = vadd.f32 %v1442_v4, %v1385_v31  ;;  %v2305_v54 = vsel %vm260_vm0, %v2300_v48, 0  ;;  %v3761_v31 = vld [vmem:[#allocation18_spill] sm:$0xff]  ;;  %v3762_v12 = vld [vmem:[#allocation20_spill] sm:$0xff] }
 0x1e2   : > { %2670 = vmatmul.msk.bf16.vlgmr.msrb.gmra.mxu0 %vm256_vm1, %v2669_v22  ;;  %2671 = vmatmul.msk.bf16.vlgmr.msrb.gmra.mxu1 %vm256_vm1, %v2669_v22 }
 0x1e3   : > { %2672 = vmatmul.msk.bf16.vlgmr.msrb.gmra.mxu2 %vm256_vm1, %v2669_v22  ;;  %2673 = vmatmul.msk.bf16.vlgmr.msrb.gmra.mxu3 %vm256_vm1, %v2669_v22 }
 0x1e4   : > { %2180 = vmatpush.bf16.msrb.mxu0 %v3751_v24  ;;  %2193 = vmatpush.bf16.msrb.mxu1 %v3752_v1 }
 0x1e5   : > { %2206 = vmatpush.bf16.msrb.mxu2 %v3753_v23  ;;  %2219 = vmatpush.bf16.msrb.mxu3 %v2171_v43 }
 0x1e6   : > { %v1455_v26 = vpop.f32.mrf.mxu2  ;;  %v1468_v33 = vpop.f32.mrf.mxu3 }
 0x1e7   : > { %v1474_v32 = vadd.f32 %v1455_v26, %v1386_v39  ;;  %v1431_v30 = vpop.f32.mrf.mxu0  ;;  %v1475_v8 = vadd.f32 %v1468_v33, %v1387_v2  ;;  %v1444_v25 = vpop.f32.mrf.mxu1 }
 0x1e8   : > { %v2366_v39 = vpop.permute.xlu2 %2365 }
 0x1e9   : > { %v2367_v22 = vsel %vm960_vm9, %v3762_v12, %v2366_v39 }
 0x1ea   : > { %v2372_v4 = vsel %vm260_vm0, %v2367_v22, 0 }
 0x1ee   : > { %v1457_v47 = vpop.f32.mrf.mxu2  ;;  %v1470_v34 = vpop.f32.mrf.mxu3 }
 0x1ef   : > { %v1517_v35 = vpop.f32.mrf.mxu0  ;;  %v1530_v19 = vpop.f32.mrf.mxu1 }
 0x1f0   : > { %v1560_v37 = vadd.f32 %v1517_v35, %v1472_v29  ;;  %v1561_v50 = vadd.f32 %v1530_v19, %v1473_v57  ;;  %v3763_v29 = vld [vmem:[#allocation23_spill] sm:$0xff]  ;;  %v3764_v57 = vld [vmem:[#allocation21_spill] sm:$0xff] }
 0x1f2   : > { %2675 = vmatmul.msk.bf16.vlgmr.msra.gmra.mxu0 %vm256_vm1, %v2674_v16  ;;  %2676 = vmatmul.msk.bf16.vlgmr.msra.gmra.mxu1 %vm256_vm1, %v2674_v16 }
 0x1f3   : > { %2677 = vmatmul.msk.bf16.vlgmr.msra.gmra.mxu2 %vm256_vm1, %v2674_v16  ;;  %2678 = vmatmul.msk.bf16.vlgmr.msra.gmra.mxu3 %vm256_vm1, %v2674_v16 }
 0x1f4   : > { %2247 = vmatpush.bf16.msra.mxu0 %v3755_v44  ;;  %2260 = vmatpush.bf16.msra.mxu1 %v3756_v61  ;;  %v2694_v61 = vld [vmem:[%s3033_s19 + $0x68] sm:$0xf] }
 0x1f5   : > { %2273 = vmatpush.bf16.msra.mxu2 %v3757_v15  ;;  %2286 = vmatpush.bf16.msra.mxu3 %v2238_v0 }
 0x1f6   : > { %v1543_v6 = vpop.f32.mrf.mxu2  ;;  %v1556_v7 = vpop.f32.mrf.mxu3 }
 0x1f7   : > { %v1562_v45 = vadd.f32 %v1543_v6, %v1474_v32  ;;  %v1519_v51 = vpop.f32.mrf.mxu0  ;;  %v1563_v41 = vadd.f32 %v1556_v7, %v1475_v8  ;;  %v1532_v42 = vpop.f32.mrf.mxu1  ;;  %v2689_v8 = vld [vmem:[%s3033_s19 + $0x64] sm:$0xf]  ;;  %s215_s19 = scalar_lea.vmem [#allocation2], %s2561_s8 }
 0x1f8   : > { %s2450_s30 = sshll.u32 %s215_s19, 4  ;;  %s2451_s30 = int_to_ptr.vmem [resolvable:$true] %s2450_s30 }
 0x1fe   : > { %v1545_v55 = vpop.f32.mrf.mxu2  ;;  %v1558_v40 = vpop.f32.mrf.mxu3 }
 0x1ff   : > { %v1605_v3 = vpop.f32.mrf.mxu0  ;;  %v1618_v17 = vpop.f32.mrf.mxu1 }
 0x200   : > { %v1648_v36 = vadd.f32 %v1605_v3, %v1560_v37  ;;  %v1649_v13 = vadd.f32 %v1618_v17, %v1561_v50 }
 0x202   : > { %2680 = vmatmul.msk.bf16.vlgmr.msrb.gmra.mxu0 %vm256_vm1, %v2679_v5  ;;  %2681 = vmatmul.msk.bf16.vlgmr.msrb.gmra.mxu1 %vm256_vm1, %v2679_v5 }
 0x203   : > { %2682 = vmatmul.msk.bf16.vlgmr.msrb.gmra.mxu2 %vm256_vm1, %v2679_v5  ;;  %2683 = vmatmul.msk.bf16.vlgmr.msrb.gmra.mxu3 %vm256_vm1, %v2679_v5 }
 0x204   : > { %2314 = vmatpush.bf16.msrb.mxu0 %v3759_v11  ;;  %2327 = vmatpush.bf16.msrb.mxu1 %v3760_v52 }
 0x205   : > { %2340 = vmatpush.bf16.msrb.mxu2 %v3761_v31  ;;  %2353 = vmatpush.bf16.msrb.mxu3 %v2305_v54 }
 0x206   : > { %v1631_v53 = vpop.f32.mrf.mxu2  ;;  %v1644_v63 = vpop.f32.mrf.mxu3 }
 0x207   : > { %v1650_v60 = vadd.f32 %v1631_v53, %v1562_v45  ;;  %v1607_v14 = vpop.f32.mrf.mxu0  ;;  %v1651_v62 = vadd.f32 %v1644_v63, %v1563_v41  ;;  %v1620_v56 = vpop.f32.mrf.mxu1 }
 0x20e   : > { %v1633_v46 = vpop.f32.mrf.mxu2  ;;  %v1646_v9 = vpop.f32.mrf.mxu3 }
 0x20f   : > { %v1693_v2 = vpop.f32.mrf.mxu0  ;;  %v1706_v20 = vpop.f32.mrf.mxu1 }
 0x210   : > { %v1736_v28 = vadd.f32 %v1693_v2, %v1648_v36  ;;  %v1737_v49 = vadd.f32 %v1706_v20, %v1649_v13 }
 0x212   : > { %2685 = vmatmul.msk.bf16.vlgmr.msra.gmra.mxu0 %vm256_vm1, %v2684_v58  ;;  %2686 = vmatmul.msk.bf16.vlgmr.msra.gmra.mxu1 %vm256_vm1, %v2684_v58 }
 0x213   : > { %2687 = vmatmul.msk.bf16.vlgmr.msra.gmra.mxu2 %vm256_vm1, %v2684_v58  ;;  %2688 = vmatmul.msk.bf16.vlgmr.msra.gmra.mxu3 %vm256_vm1, %v2684_v58 }
 0x214   : > { %2381 = vmatpush.bf16.msra.mxu0 %v3763_v29  ;;  %2394 = vmatpush.bf16.msra.mxu1 %v3764_v57 }
 0x215   : > { %2407 = vmatpush.bf16.msra.mxu2 %v3765_v21  ;;  %2420 = vmatpush.bf16.msra.mxu3 %v2372_v4 }
 0x216   : > { %v1719_v27 = vpop.f32.mrf.mxu2  ;;  %v1732_v43 = vpop.f32.mrf.mxu3 }
 0x217   : > { %v1738_v24 = vadd.f32 %v1719_v27, %v1650_v60  ;;  %v1695_v1 = vpop.f32.mrf.mxu0  ;;  %v1739_v23 = vadd.f32 %v1732_v43, %v1651_v62  ;;  %v1708_v26 = vpop.f32.mrf.mxu1 }
 0x21e   : > { %v1721_v32 = vpop.f32.mrf.mxu2  ;;  %v1734_v33 = vpop.f32.mrf.mxu3 }
 0x21f   : > { %v1781_v30 = vpop.f32.mrf.mxu0  ;;  %v1794_v47 = vpop.f32.mrf.mxu1 }
 0x220   : > { %v1824_v25 = vadd.f32 %v1781_v30, %v1736_v28  ;;  %v1825_v34 = vadd.f32 %v1794_v47, %v1737_v49 }
 0x222   : > { %2690 = vmatmul.msk.bf16.vlgmr.msrb.gmra.mxu0 %vm256_vm1, %v2689_v8  ;;  %2691 = vmatmul.msk.bf16.vlgmr.msrb.gmra.mxu1 %vm256_vm1, %v2689_v8 }
 0x223   : > { %2692 = vmatmul.msk.bf16.vlgmr.msrb.gmra.mxu2 %vm256_vm1, %v2689_v8  ;;  %2693 = vmatmul.msk.bf16.vlgmr.msrb.gmra.mxu3 %vm256_vm1, %v2689_v8 }
 0x226   : > { %v1807_v35 = vpop.f32.mrf.mxu2  ;;  %v1820_v37 = vpop.f32.mrf.mxu3 }
 0x227   : > { %v1826_v16 = vadd.f32 %v1807_v35, %v1738_v24  ;;  %v1783_v19 = vpop.f32.mrf.mxu0  ;;  %v1827_v50 = vadd.f32 %v1820_v37, %v1739_v23  ;;  %v1796_v59 = vpop.f32.mrf.mxu1 }
 0x22e   : > { %v1809_v18 = vpop.f32.mrf.mxu2  ;;  %v1822_v44 = vpop.f32.mrf.mxu3 }
 0x22f   : > { %v1845_v0 = vpop.f32.mrf.mxu0  ;;  %v1858_v6 = vpop.f32.mrf.mxu1 }
 0x230   : > { %v1888_v15 = vadd.f32 %v1845_v0, %v1824_v25  ;;  %v1889_v45 = vadd.f32 %v1858_v6, %v1825_v34 }
 0x232   : > { %2695 = vmatmul.msk.bf16.vlgmr.msra.gmra.mxu0 %vm256_vm1, %v2694_v61  ;;  %2696 = vmatmul.msk.bf16.vlgmr.msra.gmra.mxu1 %vm256_vm1, %v2694_v61 }
 0x233   : > { %2697 = vmatmul.msk.bf16.vlgmr.msra.gmra.mxu2 %vm256_vm1, %v2694_v61  ;;  %2698 = vmatmul.msk.bf16.vlgmr.msra.gmra.mxu3 %vm256_vm1, %v2694_v61 }
 0x236   : > { %v1871_v7 = vpop.f32.mrf.mxu2  ;;  %v1884_v41 = vpop.f32.mrf.mxu3 }
 0x237   : > { %v1890_v51 = vadd.f32 %v1871_v7, %v1826_v16  ;;  %v1847_v42 = vpop.f32.mrf.mxu0  ;;  %v1891_v10 = vadd.f32 %v1884_v41, %v1827_v50  ;;  %v1860_v55 = vpop.f32.mrf.mxu1 }
 0x23e   : > { %v1873_v40 = vpop.f32.mrf.mxu2  ;;  %v1886_v3 = vpop.f32.mrf.mxu3 }
 0x23f   : > { %v1914_v5 = vpop.f32.mrf.mxu0  ;;  %v1927_v17 = vpop.f32.mrf.mxu1 }
 0x240   : > { %v1957_v36 = vadd.f32 %v1914_v5, %v1888_v15  ;;  %v1958_v13 = vadd.f32 %v1927_v17, %v1889_v45 }
 0x246   : > { %v1940_v38 = vpop.f32.mrf.mxu2  ;;  %v1953_v11 = vpop.f32.mrf.mxu3 }
 0x247   : > { %v1959_v48 = vadd.f32 %v1940_v38, %v1890_v51  ;;  %v1916_v54 = vpop.f32.mrf.mxu0  ;;  %v1960_v52 = vadd.f32 %v1953_v11, %v1891_v10  ;;  %v1929_v31 = vpop.f32.mrf.mxu1 }
 0x24e   : > { %v1942_v53 = vpop.f32.mrf.mxu2  ;;  %v1955_v60 = vpop.f32.mrf.mxu3 }
 0x24f   : > { %v1981_v63 = vpop.f32.mrf.mxu0  ;;  %v1994_v62 = vpop.f32.mrf.mxu1 }
 0x250   : > { %v2024_v14 = vadd.f32 %v1981_v63, %v1957_v36  ;;  %v2025_v56 = vadd.f32 %v1994_v62, %v1958_v13 }
 0x256   : > { %v2007_v39 = vpop.f32.mrf.mxu2  ;;  %v2020_v9 = vpop.f32.mrf.mxu3 }
 0x257   : > { %v2026_v46 = vadd.f32 %v2007_v39, %v1959_v48  ;;  %v1983_v2 = vpop.f32.mrf.mxu0  ;;  %v2027_v58 = vadd.f32 %v2020_v9, %v1960_v52  ;;  %v1996_v28 = vpop.f32.mrf.mxu1 }
 0x25e   : > { %v2009_v20 = vpop.f32.mrf.mxu2  ;;  %v2022_v49 = vpop.f32.mrf.mxu3 }
 0x25f   : > { %v2048_v12 = vpop.f32.mrf.mxu0  ;;  %v2061_v29 = vpop.f32.mrf.mxu1 }
 0x260   : > { %v2091_v22 = vadd.f32 %v2048_v12, %v2024_v14  ;;  %v2092_v4 = vadd.f32 %v2061_v29, %v2025_v56 }
 0x266   : > { %v2074_v57 = vpop.f32.mrf.mxu2  ;;  %v2087_v27 = vpop.f32.mrf.mxu3 }
 0x267   : > { %v2093_v21 = vadd.f32 %v2074_v57, %v2026_v46  ;;  %v2050_v24 = vpop.f32.mrf.mxu0  ;;  %v2094_v43 = vadd.f32 %v2087_v27, %v2027_v58  ;;  %v2063_v1 = vpop.f32.mrf.mxu1 }
 0x26e   : > { %v2076_v23 = vpop.f32.mrf.mxu2  ;;  %v2089_v26 = vpop.f32.mrf.mxu3 }
 0x26f   : > { %v2115_v32 = vpop.f32.mrf.mxu0  ;;  %v2128_v33 = vpop.f32.mrf.mxu1 }
 0x270   : > { %v2158_v36 = vadd.f32 %v2115_v32, %v2091_v22  ;;  %v2159_v13 = vadd.f32 %v2128_v33, %v2092_v4 }
 0x276   : > { %v2141_v30 = vpop.f32.mrf.mxu2  ;;  %v2154_v8 = vpop.f32.mrf.mxu3 }
 0x277   : > { %v2117_v25 = vpop.f32.mrf.mxu0  ;;  %v2130_v47 = vpop.f32.mrf.mxu1  ;;  %v2160_v53 = vadd.f32 %v2141_v30, %v2093_v21  ;;  %v2161_v62 = vadd.f32 %v2154_v8, %v2094_v43 }
 0x27e   : > { %v2143_v34 = vpop.f32.mrf.mxu2  ;;  %v2156_v35 = vpop.f32.mrf.mxu3 }
 0x27f   : > { %v2182_v16 = vpop.f32.mrf.mxu0  ;;  %v2195_v37 = vpop.f32.mrf.mxu1 }
 0x280   : > { %v2225_v38 = vadd.f32 %v2182_v16, %v2158_v36  ;;  %v2226_v48 = vadd.f32 %v2195_v37, %v2159_v13 }
 0x286   : > { %v2208_v19 = vpop.f32.mrf.mxu2  ;;  %v2221_v50 = vpop.f32.mrf.mxu3 }
 0x287   : > { %v2184_v59 = vpop.f32.mrf.mxu0  ;;  %v2197_v18 = vpop.f32.mrf.mxu1  ;;  %v2227_v46 = vadd.f32 %v2208_v19, %v2160_v53  ;;  %v2228_v2 = vadd.f32 %v2221_v50, %v2161_v62 }
 0x28e   : > { %v2210_v44 = vpop.f32.mrf.mxu2  ;;  %v2223_v0 = vpop.f32.mrf.mxu3 }
 0x28f   : > { %v2249_v61 = vpop.f32.mrf.mxu0  ;;  %v2262_v15 = vpop.f32.mrf.mxu1 }
 0x290   : > { %v2292_v11 = vadd.f32 %v2249_v61, %v2225_v38  ;;  %v2293_v54 = vadd.f32 %v2262_v15, %v2226_v48 }
 0x296   : > { %v2275_v6 = vpop.f32.mrf.mxu2  ;;  %v2288_v45 = vpop.f32.mrf.mxu3 }
 0x297   : > { %v2251_v7 = vpop.f32.mrf.mxu0  ;;  %v2264_v51 = vpop.f32.mrf.mxu1  ;;  %v2294_v58 = vadd.f32 %v2275_v6, %v2227_v46  ;;  %v2295_v28 = vadd.f32 %v2288_v45, %v2228_v2 }
 0x29e   : > { %v2277_v41 = vpop.f32.mrf.mxu2  ;;  %v2290_v42 = vpop.f32.mrf.mxu3 }
 0x29f   : > { %v2316_v10 = vpop.f32.mrf.mxu0  ;;  %v2329_v55 = vpop.f32.mrf.mxu1 }
 0x2a0   : > { %v2359_v52 = vadd.f32 %v2316_v10, %v2292_v11  ;;  %v2360_v60 = vadd.f32 %v2329_v55, %v2293_v54 }
 0x2a6   : > { %v2342_v40 = vpop.f32.mrf.mxu2  ;;  %v2355_v3 = vpop.f32.mrf.mxu3 }
 0x2a7   : > { %v2318_v5 = vpop.f32.mrf.mxu0  ;;  %v2331_v17 = vpop.f32.mrf.mxu1  ;;  %v2361_v20 = vadd.f32 %v2342_v40, %v2294_v58  ;;  %v2362_v49 = vadd.f32 %v2355_v3, %v2295_v28 }
 0x2ae   : > { %v2344_v31 = vpop.f32.mrf.mxu2  ;;  %v2357_v63 = vpop.f32.mrf.mxu3 }
 0x2af   : > { %v2383_v14 = vpop.f32.mrf.mxu0  ;;  %v2396_v39 = vpop.f32.mrf.mxu1 }
 0x2b0   : > { %v2426_v56 = vadd.f32 %v2383_v14, %v2359_v52  ;;  %v2427_v9 = vadd.f32 %v2396_v39, %v2360_v60 }
 0x2b2   : > { %2430 = vst [vmem:[%s215_s19] sm:$0xff] %v2426_v56 }
 0x2b3   : > { %2431 = vst [vmem:[%s215_s19 + $0x8] sm:$0xff] %v2427_v9 }
 0x2b6   : > { %v2409_v12 = vpop.f32.mrf.mxu2  ;;  %v2422_v29 = vpop.f32.mrf.mxu3 }
 0x2b7   : > { %v2428_v22 = vadd.f32 %v2409_v12, %v2361_v20  ;;  %v2385_v4 = vpop.f32.mrf.mxu0  ;;  %v2429_v57 = vadd.f32 %v2422_v29, %v2362_v49  ;;  %v2398_v21 = vpop.f32.mrf.mxu1 }
 0x2b9   : > { %2432 = vst [vmem:[%s215_s19 + $0x10] sm:$0xff] %v2428_v22 }
 0x2ba   : > { %2433 = vst [vmem:[%s215_s19 + $0x18] sm:$0xff] %v2429_v57 }
 0x2bb   : > { %2808 = shalt.err (!%p2805_p5)
}
 0x2bc   : > { %2707 = dma.vmem_to_hbm [thread:$0]  (%p2939_p4), %s2451_s30, 512, %s2453_s10, %s2435_s15  }
 0x2be   : > { %v2411_v27 = vpop.f32.mrf.mxu2  ;;  %v2424_v24 = vpop.f32.mrf.mxu3 }
 0x2bf PF: > { %p2713_p6 = scmp.ge.s32.totalorder %s2859_s17, 2  ;;  %s2464_s6 = sand.u32 1, %s2839_s12  }
 0x2c0   : > { %s2465_s7 = scalar_lea.sflag [#allocation3], %s2464_s6 }
 0x2c1   : > { %p2710_p7 = pnand %p2713_p6, %p2946_p8 }
 0x2c3   : > { %p2711_p9 = pneg %p2710_p7 }
 0x2c5   : > { %2834 = dma.done.wait (%p2711_p9), %s2465_s7, 512  }
 0x2c6   : > { %2836 = vsyncadd (%p2711_p9), %s2465_s7, 4294966784  ;;  %s16_s17 = sadd.s32 1, %s2859_s17   ;;  %s3766_s12 = smov %s2843_s13 }
 0x2c7   : > { %p13_p10 = scmp.ge.s32.totalorder %s16_s17, 4   ;;  %s3767_s13 = smov %s2847_s14 }
 0x2c8   : > { %s3768_s14 = smov %s2952_s25  ;;  %s3769_s15 = smov %s2855_s16 }
 0x2c9   : > { %s3770_s16 = smov %s3772_s20  ;;  %15 = sbr.rel (!%p13_p10) target bundleno = 4 (0x4), region = 99 }
 0x2ce   :  { %2471 = vsyncpa [#allocation3], 1 }
 0x2cf   :  { %2473 = vsyncpa [#allocation3 + $0x1], 1 }

</bundles_post_ra>
